<compile_context>
chip_gen: v7x
topology: tpu7x:2x2x1
jax: 0.10.0
libtpu: 0.0.40
codegen_flags: <defaults>
</compile_context>

<pallas_src>
import functools

import jax
import jax.numpy as jnp
from jax.experimental import pallas as pl
from jax.experimental.pallas import tpu as pltpu

D = 256          # hidden / fusion dim (Prediction_Head input dim in MGVLF)
VOCAB = 1000     # synthetic vocab for the text stand-in
PATCH = 4        # patch size for the visual stand-in
MPAD = 128       # lane-padded mask width (>= L and >= Np)
NW = 11          # planes in the packed (NW, D, D) weight slab
NB = 16          # rows in the packed (NB, D) bias slab (11 used, padded to 16)

# Plane / row indices inside the packed slabs (encoder layers occupy 0..3).
W_POOL, W_SENT, W_FLP, W_FUSE, W_PH1, W_PH2, W_PATCH = 4, 5, 6, 7, 8, 9, 10
B_POOL, B_SENT, B_FLP, B_FUSE, B_PH1, B_PH2, B_PATCH = 4, 5, 6, 7, 8, 9, 10


# ----------------------------------------------------------------------------
# The single fused Pallas kernel (one batch-block per grid step)
# ----------------------------------------------------------------------------
def _mgvlf_kernel(tok_ref, patch_ref, mask_ref, w_ref, b_ref, o_ref,
                  *, BB, L, Np):
    f32, bf16 = jnp.float32, jnp.bfloat16

    def mm(x, wi, bi):
        # bf16 MXU operands, f32 accumulation, f32 bias add / epilogue.
        return (jnp.dot(x.astype(bf16), w_ref[wi], preferred_element_type=f32)
                + b_ref[bi:bi + 1, :])

    # ---- text model (synthetic BERT stand-in) -------------------------------
    # TODO(synk): real pretrained BertModel (12-layer transformer) is replaced
    # by embedding (gathered outside) + 4 tanh-linear encoder layers.
    # Residual stream stays bf16; only the tanh epilogue / accumulator are f32.
    h = tok_ref[...].reshape(BB * L, D)                         # (BB*L, D) bf16
    fl_sum = jnp.zeros((BB * L, D), f32)
    for i in range(4):                                          # static unroll
        t = jnp.tanh(jnp.dot(h, w_ref[i], preferred_element_type=f32)
                     + b_ref[i:i + 1, :])                       # f32 epilogue
        h = t.astype(bf16)
        fl_sum = fl_sum + t

    # fl = (layer[-1] + layer[-2] + layer[-3] + layer[-4]) / 4   (exact MGVLF op)
    fl = fl_sum * 0.25                                          # (BB*L, D) f32

    # BERT-style pooler: tanh-linear on the [CLS] token of the last layer.
    cls = h.reshape(BB, L, D)[:, 0, :]                          # (BB, D) bf16
    pooled = jnp.tanh(mm(cls, W_POOL, B_POOL))                  # (BB, D) f32

    masks = mask_ref[...]                                       # (BB, 2, MPAD)
    wm = masks[:, 0, :L]                                        # (BB, L)
    pv = masks[:, 1, :Np]                                       # (BB, Np)

    # Masked mean of fl over text tokens (text context vector).
    fl3 = fl.reshape(BB, L, D)
    txt_ctx = (jnp.sum(fl3 * wm[:, :, None], axis=1)
               / jnp.maximum(jnp.sum(wm, axis=1, keepdims=True), 1.0))

    # ---- visual model (synthetic CNN_MGVLF stand-in) -------------------------
    # TODO(synk): DETR-R50 backbone + multi-granularity fusion replaced by a
    # patch projection conditioned on text features.
    vis = mm(patch_ref[...].reshape(BB * Np, D),
             W_PATCH, B_PATCH).reshape(BB, Np, D)
    sent = mm(pooled, W_SENT, B_SENT)                           # (BB, D)
    fv = (vis * pv[:, :, None]
          + sent[:, None, :] + txt_ctx[:, None, :])             # (BB, Np, D)

    # ---- VL fusion model (synthetic VLFusion stand-in) ------------------------
    # TODO(synk): VLFusion transformer + [REG] token replaced by masked pooling
    # over the concatenated visual/text tokens + tanh-linear.
    fl_proj = mm(fl, W_FLP, B_FLP).reshape(BB, L, D)            # (BB, L, D)
    num = (jnp.sum(fv * pv[:, :, None], axis=1)
           + jnp.sum(fl_proj * wm[:, :, None], axis=1))         # (BB, D)
    den = (jnp.sum(pv, axis=1, keepdims=True)
           + jnp.sum(wm, axis=1, keepdims=True))                # (BB, 1)
    pooled_vl = num / jnp.maximum(den, 1.0)
    x = jnp.tanh(mm(pooled_vl, W_FUSE, B_FUSE))                 # (BB, D)

    # ---- Prediction_Head + sigmoid*2-0.5 (exact MGVLF semantics) --------------
    h1 = jnp.maximum(mm(x, W_PH1, B_PH1), 0.0)                  # Linear + ReLU
    y = mm(h1, W_PH2, B_PH2)                                    # (BB, D); cols >= 4 pad
    o_ref[...] = jax.nn.sigmoid(y) * 2.0 - 0.5                  # lane-dense store


# ----------------------------------------------------------------------------
# Parameters (deterministic, in-script; no checkpoint loading)
# ----------------------------------------------------------------------------
def init_params(key):
    ks = jax.random.split(key, 16)

    def w(k, shape, scale=0.05):
        return jax.random.normal(k, shape, jnp.float32) * scale

    patch_dim = 3 * PATCH * PATCH                                # 48
    p = {"emb": w(ks[0], (VOCAB, D))}                            # gathered outside

    # ---- packed (NW, D, D) bf16 weight slab ----
    planes = [w(ks[1 + i], (D, D)) for i in range(4)]            # enc layers 0..3
    planes.append(w(ks[5], (D, D)))                              # W_POOL
    planes.append(w(ks[6], (D, D)))                              # W_SENT
    planes.append(w(ks[7], (D, D)))                              # W_FLP
    planes.append(w(ks[8], (D, D)))                              # W_FUSE
    planes.append(w(ks[9], (D, D), scale=(6.0 / (D + D)) ** 0.5))    # W_PH1
    ph_w2 = w(ks[10], (D, 4), scale=(6.0 / (D + 4)) ** 0.5)
    planes.append(jnp.pad(ph_w2, ((0, 0), (0, D - 4))))          # W_PH2 (4 -> 256 cols)
    patch_w = w(ks[11], (patch_dim, D))
    planes.append(jnp.pad(patch_w, ((0, D - patch_dim), (0, 0))))  # W_PATCH (48 -> 256 rows)
    p["w"] = jnp.stack(planes).astype(jnp.bfloat16)              # (11, D, D)

    # ---- packed (NB, D) f32 bias slab ----
    b = jnp.zeros((NB, D), jnp.float32)
    b = b.at[:9, :].set(w(ks[12], (9, D), scale=0.02))           # enc0-3/pool/sent/flp/fuse/ph_b1
    b = b.at[B_PH2, :4].set(w(ks[13], (4,), scale=0.02))         # ph_b2 (pad cols stay 0)
    b = b.at[B_PATCH, :].set(w(ks[14], (D,), scale=0.02))        # patch bias
    p["b"] = b
    return p


# ----------------------------------------------------------------------------
# MGVLF forward: thin XLA glue (gather / patchify / mask reduce) + 1 pallas_call
# ----------------------------------------------------------------------------
def mgvlf_forward(params, image, mask, word_id, word_mask):
    B, C, H, W = image.shape
    L = word_id.shape[1]
    Hp, Wp = H // PATCH, W // PATCH
    Np = Hp * Wp
    patch_dim = C * PATCH * PATCH

    # Plumbing outside the kernel (cheap XLA ops, no Pallas equivalent needed).
    tok = jnp.take(params["emb"], word_id, axis=0).astype(jnp.bfloat16)   # (B, L, D)
    patches = (image.reshape(B, C, Hp, PATCH, Wp, PATCH)
               .transpose(0, 2, 4, 1, 3, 5)
               .reshape(B, Np, patch_dim))
    patches = jnp.pad(patches, ((0, 0), (0, 0), (0, D - patch_dim)))
    patches = patches.astype(jnp.bfloat16)                                # (B, Np, D)

    patch_pad = jnp.all(mask.reshape(B, Hp, PATCH, Wp, PATCH), axis=(2, 4))
    pv = (~patch_pad).astype(jnp.float32).reshape(B, Np)                  # (B, Np)
    wm = word_mask.astype(jnp.float32)                                    # (B, L)
    masks = (jnp.zeros((B, 2, MPAD), jnp.float32)
             .at[:, 0, :L].set(wm)
             .at[:, 1, :Np].set(pv))                                      # packed mask slab

    # One batch block per grid step; BB=B at toy shapes (grid=(1,)).  For large
    # B, set BB to a multiple of 8 to shard batches across v7x's 2 TensorCores.
    BB = B
    grid = (pl.cdiv(B, BB),)
    kern = functools.partial(_mgvlf_kernel, BB=BB, L=L, Np=Np)

    out_pad = pl.pallas_call(
        kern,
        out_shape=jax.ShapeDtypeStruct((B, D), jnp.float32),
        grid=grid,
        in_specs=[
            pl.BlockSpec((BB, L, D), lambda i: (i, 0, 0)),      # tokens
            pl.BlockSpec((BB, Np, D), lambda i: (i, 0, 0)),     # patches
            pl.BlockSpec((BB, 2, MPAD), lambda i: (i, 0, 0)),   # masks
            pl.BlockSpec((NW, D, D), lambda i: (0, 0, 0)),      # weight slab (resident)
            pl.BlockSpec((NB, D), lambda i: (0, 0)),            # bias slab (resident)
        ],
        out_specs=pl.BlockSpec((BB, D), lambda i: (i, 0)),
        compiler_params=pltpu.CompilerParams(
            dimension_semantics=("parallel",),
            vmem_limit_bytes=32 * 1024 * 1024),
    )(tok, patches, masks, params["w"], params["b"])

    return out_pad[:, :4]                                        # (B, 4)


# ----------------------------------------------------------------------------
if __name__ == "__main__":
    key = jax.random.PRNGKey(0)
    kp, ki, kw = jax.random.split(key, 3)
    params = init_params(kp)

    B, C, H, W, L = 2, 3, 16, 16, 8
    image = jax.random.normal(ki, (B, C, H, W), jnp.float32)         # NCHW
    mask = jnp.zeros((B, H, W), jnp.bool_).at[1, :, 12:].set(True)    # DETR pad mask
    word_id = jax.random.randint(kw, (B, L), 0, VOCAB, dtype=jnp.int32)
    word_mask = jnp.ones((B, L), jnp.int32).at[1, 6:].set(0)

    fwd = jax.jit(mgvlf_forward)
    out = fwd(params, image, mask, word_id, word_mask)
    out = jax.block_until_ready(out)
    assert out.shape == (B, 4) and out.dtype == jnp.float32
    assert bool(jnp.all(jnp.isfinite(out)))
    print("KERNEL_OK")
</pallas_src>

<mosaic_0001>
module attributes {stable_mosaic.version = 11 : i64} {
  func.func @_mgvlf_kernel(%arg0: i32, %arg1: memref<2x8x256xbf16, #tpu.memory_space<vmem>>, %arg2: memref<2x16x256xbf16, #tpu.memory_space<vmem>>, %arg3: memref<2x2x128xf32, #tpu.memory_space<vmem>>, %arg4: memref<11x256x256xbf16, #tpu.memory_space<vmem>>, %arg5: memref<16x256xf32, #tpu.memory_space<vmem>>, %arg6: memref<2x256xf32, #tpu.memory_space<vmem>>) attributes {dimension_semantics = [#tpu.dimension_semantics<parallel>], iteration_bounds = array<i64: 1>, scalar_prefetch = 0 : i64, scratch_operands = 0 : i64, tpu.core_type = #tpu.core_type<tc>, window_params = [{transform_indices = @transform_0, window_bounds = array<i64: 2, 8, 256>}, {transform_indices = @transform_1, window_bounds = array<i64: 2, 16, 256>}, {transform_indices = @transform_2, window_bounds = array<i64: 2, 2, 128>}, {pipeline_mode = #tpu.pipeline_mode<synchronous>, transform_indices = @transform_3, window_bounds = array<i64: 11, 256, 256>}, {pipeline_mode = #tpu.pipeline_mode<synchronous>, transform_indices = @transform_4, window_bounds = array<i64: 16, 256>}, {transform_indices = @transform_5, window_bounds = array<i64: 2, 256>}]} {
    %c0 = arith.constant 0 : index
    %c0_0 = arith.constant 0 : index
    %c0_1 = arith.constant 0 : index
    %0 = vector.load %arg1[%c0, %c0_0, %c0_1] : memref<2x8x256xbf16, #tpu.memory_space<vmem>>, vector<2x8x256xbf16>
    %1 = vector.shape_cast %0 : vector<2x8x256xbf16> to vector<16x256xbf16>
    %cst = arith.constant 0.000000e+00 : f32
    %2 = vector.broadcast %cst : f32 to vector<16x256xf32>
    %c0_2 = arith.constant 0 : index
    %c0_3 = arith.constant 0 : index
    %c0_4 = arith.constant 0 : index
    %3 = vector.load %arg4[%c0_2, %c0_3, %c0_4] : memref<11x256x256xbf16, #tpu.memory_space<vmem>>, vector<1x256x256xbf16>
    %4 = vector.shape_cast %3 : vector<1x256x256xbf16> to vector<256x256xbf16>
    %cst_5 = arith.constant dense<0.000000e+00> : vector<16x256xf32>
    %5 = tpu.matmul %1, %4, %cst_5 {dimension_numbers = #tpu.dot_dimension_numbers<[1], [0], [0], [1], [0, 0, 1, 1], [], []>} : vector<16x256xbf16>, vector<256x256xbf16>, vector<16x256xf32> -> vector<16x256xf32>
    %c0_6 = arith.constant 0 : index
    %c0_7 = arith.constant 0 : index
    %6 = vector.load %arg5[%c0_6, %c0_7] : memref<16x256xf32, #tpu.memory_space<vmem>>, vector<1x256xf32>
    %7 = vector.broadcast %6 : vector<1x256xf32> to vector<16x256xf32>
    %8 = arith.addf %5, %7 : vector<16x256xf32>
    %9 = math.tanh %8 : vector<16x256xf32>
    %10 = arith.truncf %9 : vector<16x256xf32> to vector<16x256xbf16>
    %11 = arith.addf %2, %9 : vector<16x256xf32>
    %c1 = arith.constant 1 : index
    %c0_8 = arith.constant 0 : index
    %c0_9 = arith.constant 0 : index
    %12 = vector.load %arg4[%c1, %c0_8, %c0_9] : memref<11x256x256xbf16, #tpu.memory_space<vmem>>, vector<1x256x256xbf16>
    %13 = vector.shape_cast %12 : vector<1x256x256xbf16> to vector<256x256xbf16>
    %cst_10 = arith.constant dense<0.000000e+00> : vector<16x256xf32>
    %14 = tpu.matmul %10, %13, %cst_10 {dimension_numbers = #tpu.dot_dimension_numbers<[1], [0], [0], [1], [0, 0, 1, 1], [], []>} : vector<16x256xbf16>, vector<256x256xbf16>, vector<16x256xf32> -> vector<16x256xf32>
    %c1_11 = arith.constant 1 : index
    %c0_12 = arith.constant 0 : index
    %15 = vector.load %arg5[%c1_11, %c0_12] : memref<16x256xf32, #tpu.memory_space<vmem>>, vector<1x256xf32>
    %16 = vector.broadcast %15 : vector<1x256xf32> to vector<16x256xf32>
    %17 = arith.addf %14, %16 : vector<16x256xf32>
    %18 = math.tanh %17 : vector<16x256xf32>
    %19 = arith.truncf %18 : vector<16x256xf32> to vector<16x256xbf16>
    %20 = arith.addf %11, %18 : vector<16x256xf32>
    %c2 = arith.constant 2 : index
    %c0_13 = arith.constant 0 : index
    %c0_14 = arith.constant 0 : index
    %21 = vector.load %arg4[%c2, %c0_13, %c0_14] : memref<11x256x256xbf16, #tpu.memory_space<vmem>>, vector<1x256x256xbf16>
    %22 = vector.shape_cast %21 : vector<1x256x256xbf16> to vector<256x256xbf16>
    %cst_15 = arith.constant dense<0.000000e+00> : vector<16x256xf32>
    %23 = tpu.matmul %19, %22, %cst_15 {dimension_numbers = #tpu.dot_dimension_numbers<[1], [0], [0], [1], [0, 0, 1, 1], [], []>} : vector<16x256xbf16>, vector<256x256xbf16>, vector<16x256xf32> -> vector<16x256xf32>
    %c2_16 = arith.constant 2 : index
    %c0_17 = arith.constant 0 : index
    %24 = vector.load %arg5[%c2_16, %c0_17] : memref<16x256xf32, #tpu.memory_space<vmem>>, vector<1x256xf32>
    %25 = vector.broadcast %24 : vector<1x256xf32> to vector<16x256xf32>
    %26 = arith.addf %23, %25 : vector<16x256xf32>
    %27 = math.tanh %26 : vector<16x256xf32>
    %28 = arith.truncf %27 : vector<16x256xf32> to vector<16x256xbf16>
    %29 = arith.addf %20, %27 : vector<16x256xf32>
    %c3 = arith.constant 3 : index
    %c0_18 = arith.constant 0 : index
    %c0_19 = arith.constant 0 : index
    %30 = vector.load %arg4[%c3, %c0_18, %c0_19] : memref<11x256x256xbf16, #tpu.memory_space<vmem>>, vector<1x256x256xbf16>
    %31 = vector.shape_cast %30 : vector<1x256x256xbf16> to vector<256x256xbf16>
    %cst_20 = arith.constant dense<0.000000e+00> : vector<16x256xf32>
    %32 = tpu.matmul %28, %31, %cst_20 {dimension_numbers = #tpu.dot_dimension_numbers<[1], [0], [0], [1], [0, 0, 1, 1], [], []>} : vector<16x256xbf16>, vector<256x256xbf16>, vector<16x256xf32> -> vector<16x256xf32>
    %c3_21 = arith.constant 3 : index
    %c0_22 = arith.constant 0 : index
    %33 = vector.load %arg5[%c3_21, %c0_22] : memref<16x256xf32, #tpu.memory_space<vmem>>, vector<1x256xf32>
    %34 = vector.broadcast %33 : vector<1x256xf32> to vector<16x256xf32>
    %35 = arith.addf %32, %34 : vector<16x256xf32>
    %36 = math.tanh %35 : vector<16x256xf32>
    %37 = arith.truncf %36 : vector<16x256xf32> to vector<16x256xbf16>
    %38 = arith.addf %29, %36 : vector<16x256xf32>
    %cst_23 = arith.constant 2.500000e-01 : f32
    %39 = vector.broadcast %cst_23 : f32 to vector<16x256xf32>
    %40 = arith.mulf %38, %39 : vector<16x256xf32>
    %41 = vector.shape_cast %37 : vector<16x256xbf16> to vector<2x8x256xbf16>
    %42 = vector.extract_strided_slice %41 {offsets = [0, 0, 0], sizes = [2, 1, 256], strides = [1, 1, 1]} : vector<2x8x256xbf16> to vector<2x1x256xbf16>
    %43 = vector.shape_cast %42 : vector<2x1x256xbf16> to vector<2x256xbf16>
    %c4 = arith.constant 4 : index
    %c0_24 = arith.constant 0 : index
    %c0_25 = arith.constant 0 : index
    %44 = vector.load %arg4[%c4, %c0_24, %c0_25] : memref<11x256x256xbf16, #tpu.memory_space<vmem>>, vector<1x256x256xbf16>
    %45 = vector.shape_cast %44 : vector<1x256x256xbf16> to vector<256x256xbf16>
    %cst_26 = arith.constant dense<0.000000e+00> : vector<2x256xf32>
    %46 = tpu.matmul %43, %45, %cst_26 {dimension_numbers = #tpu.dot_dimension_numbers<[1], [0], [0], [1], [0, 0, 1, 1], [], []>} : vector<2x256xbf16>, vector<256x256xbf16>, vector<2x256xf32> -> vector<2x256xf32>
    %c4_27 = arith.constant 4 : index
    %c0_28 = arith.constant 0 : index
    %47 = vector.load %arg5[%c4_27, %c0_28] : memref<16x256xf32, #tpu.memory_space<vmem>>, vector<1x256xf32>
    %48 = vector.broadcast %47 : vector<1x256xf32> to vector<2x256xf32>
    %49 = arith.addf %46, %48 : vector<2x256xf32>
    %50 = math.tanh %49 : vector<2x256xf32>
    %c0_29 = arith.constant 0 : index
    %c0_30 = arith.constant 0 : index
    %c0_31 = arith.constant 0 : index
    %51 = vector.load %arg3[%c0_29, %c0_30, %c0_31] : memref<2x2x128xf32, #tpu.memory_space<vmem>>, vector<2x2x128xf32>
    %52 = vector.extract_strided_slice %51 {offsets = [0, 0, 0], sizes = [2, 1, 8], strides = [1, 1, 1]} : vector<2x2x128xf32> to vector<2x1x8xf32>
    %53 = vector.shape_cast %52 : vector<2x1x8xf32> to vector<2x8xf32>
    %54 = vector.extract_strided_slice %51 {offsets = [0, 1, 0], sizes = [2, 1, 16], strides = [1, 1, 1]} : vector<2x2x128xf32> to vector<2x1x16xf32>
    %55 = vector.shape_cast %54 : vector<2x1x16xf32> to vector<2x16xf32>
    %56 = vector.shape_cast %40 : vector<16x256xf32> to vector<2x8x256xf32>
    %57 = vector.shape_cast %53 : vector<2x8xf32> to vector<2x8x1xf32>
    %58 = vector.broadcast %57 : vector<2x8x1xf32> to vector<2x8x256xf32>
    %59 = arith.mulf %56, %58 : vector<2x8x256xf32>
    %cst_32 = arith.constant dense<0.000000e+00> : vector<2x256xf32>
    %60 = vector.multi_reduction <add>, %59, %cst_32 [1] : vector<2x8x256xf32> to vector<2x256xf32>
    %cst_33 = arith.constant dense<0.000000e+00> : vector<2xf32>
    %61 = vector.multi_reduction <add>, %53, %cst_33 [1] : vector<2x8xf32> to vector<2xf32>
    %62 = vector.shape_cast %61 : vector<2xf32> to vector<2x1xf32>
    %cst_34 = arith.constant 1.000000e+00 : f32
    %63 = vector.broadcast %cst_34 : f32 to vector<2x1xf32>
    %64 = arith.maximumf %62, %63 : vector<2x1xf32>
    %65 = vector.broadcast %64 : vector<2x1xf32> to vector<2x256xf32>
    %66 = arith.divf %60, %65 : vector<2x256xf32>
    %c0_35 = arith.constant 0 : index
    %c0_36 = arith.constant 0 : index
    %c0_37 = arith.constant 0 : index
    %67 = vector.load %arg2[%c0_35, %c0_36, %c0_37] : memref<2x16x256xbf16, #tpu.memory_space<vmem>>, vector<2x16x256xbf16>
    %68 = vector.shape_cast %67 : vector<2x16x256xbf16> to vector<32x256xbf16>
    %c10 = arith.constant 10 : index
    %c0_38 = arith.constant 0 : index
    %c0_39 = arith.constant 0 : index
    %69 = vector.load %arg4[%c10, %c0_38, %c0_39] : memref<11x256x256xbf16, #tpu.memory_space<vmem>>, vector<1x256x256xbf16>
    %70 = vector.shape_cast %69 : vector<1x256x256xbf16> to vector<256x256xbf16>
    %cst_40 = arith.constant dense<0.000000e+00> : vector<32x256xf32>
    %71 = tpu.matmul %68, %70, %cst_40 {dimension_numbers = #tpu.dot_dimension_numbers<[1], [0], [0], [1], [0, 0, 1, 1], [], []>} : vector<32x256xbf16>, vector<256x256xbf16>, vector<32x256xf32> -> vector<32x256xf32>
    %c10_41 = arith.constant 10 : index
    %c0_42 = arith.constant 0 : index
    %72 = vector.load %arg5[%c10_41, %c0_42] : memref<16x256xf32, #tpu.memory_space<vmem>>, vector<1x256xf32>
    %73 = vector.broadcast %72 : vector<1x256xf32> to vector<32x256xf32>
    %74 = arith.addf %71, %73 : vector<32x256xf32>
    %75 = vector.shape_cast %74 : vector<32x256xf32> to vector<2x16x256xf32>
    %76 = arith.truncf %50 : vector<2x256xf32> to vector<2x256xbf16>
    %c5 = arith.constant 5 : index
    %c0_43 = arith.constant 0 : index
    %c0_44 = arith.constant 0 : index
    %77 = vector.load %arg4[%c5, %c0_43, %c0_44] : memref<11x256x256xbf16, #tpu.memory_space<vmem>>, vector<1x256x256xbf16>
    %78 = vector.shape_cast %77 : vector<1x256x256xbf16> to vector<256x256xbf16>
    %cst_45 = arith.constant dense<0.000000e+00> : vector<2x256xf32>
    %79 = tpu.matmul %76, %78, %cst_45 {dimension_numbers = #tpu.dot_dimension_numbers<[1], [0], [0], [1], [0, 0, 1, 1], [], []>} : vector<2x256xbf16>, vector<256x256xbf16>, vector<2x256xf32> -> vector<2x256xf32>
    %c5_46 = arith.constant 5 : index
    %c0_47 = arith.constant 0 : index
    %80 = vector.load %arg5[%c5_46, %c0_47] : memref<16x256xf32, #tpu.memory_space<vmem>>, vector<1x256xf32>
    %81 = vector.broadcast %80 : vector<1x256xf32> to vector<2x256xf32>
    %82 = arith.addf %79, %81 : vector<2x256xf32>
    %83 = vector.shape_cast %55 : vector<2x16xf32> to vector<2x16x1xf32>
    %84 = vector.broadcast %83 : vector<2x16x1xf32> to vector<2x16x256xf32>
    %85 = arith.mulf %75, %84 : vector<2x16x256xf32>
    %86 = vector.shape_cast %82 : vector<2x256xf32> to vector<2x1x256xf32>
    %87 = vector.broadcast %86 : vector<2x1x256xf32> to vector<2x16x256xf32>
    %88 = arith.addf %85, %87 : vector<2x16x256xf32>
    %89 = vector.shape_cast %66 : vector<2x256xf32> to vector<2x1x256xf32>
    %90 = vector.broadcast %89 : vector<2x1x256xf32> to vector<2x16x256xf32>
    %91 = arith.addf %88, %90 : vector<2x16x256xf32>
    %92 = arith.truncf %40 : vector<16x256xf32> to vector<16x256xbf16>
    %c6 = arith.constant 6 : index
    %c0_48 = arith.constant 0 : index
    %c0_49 = arith.constant 0 : index
    %93 = vector.load %arg4[%c6, %c0_48, %c0_49] : memref<11x256x256xbf16, #tpu.memory_space<vmem>>, vector<1x256x256xbf16>
    %94 = vector.shape_cast %93 : vector<1x256x256xbf16> to vector<256x256xbf16>
    %cst_50 = arith.constant dense<0.000000e+00> : vector<16x256xf32>
    %95 = tpu.matmul %92, %94, %cst_50 {dimension_numbers = #tpu.dot_dimension_numbers<[1], [0], [0], [1], [0, 0, 1, 1], [], []>} : vector<16x256xbf16>, vector<256x256xbf16>, vector<16x256xf32> -> vector<16x256xf32>
    %c6_51 = arith.constant 6 : index
    %c0_52 = arith.constant 0 : index
    %96 = vector.load %arg5[%c6_51, %c0_52] : memref<16x256xf32, #tpu.memory_space<vmem>>, vector<1x256xf32>
    %97 = vector.broadcast %96 : vector<1x256xf32> to vector<16x256xf32>
    %98 = arith.addf %95, %97 : vector<16x256xf32>
    %99 = vector.shape_cast %98 : vector<16x256xf32> to vector<2x8x256xf32>
    %100 = vector.shape_cast %55 : vector<2x16xf32> to vector<2x16x1xf32>
    %101 = vector.broadcast %100 : vector<2x16x1xf32> to vector<2x16x256xf32>
    %102 = arith.mulf %91, %101 : vector<2x16x256xf32>
    %cst_53 = arith.constant dense<0.000000e+00> : vector<2x256xf32>
    %103 = vector.multi_reduction <add>, %102, %cst_53 [1] : vector<2x16x256xf32> to vector<2x256xf32>
    %104 = vector.shape_cast %53 : vector<2x8xf32> to vector<2x8x1xf32>
    %105 = vector.broadcast %104 : vector<2x8x1xf32> to vector<2x8x256xf32>
    %106 = arith.mulf %99, %105 : vector<2x8x256xf32>
    %cst_54 = arith.constant dense<0.000000e+00> : vector<2x256xf32>
    %107 = vector.multi_reduction <add>, %106, %cst_54 [1] : vector<2x8x256xf32> to vector<2x256xf32>
    %108 = arith.addf %103, %107 : vector<2x256xf32>
    %cst_55 = arith.constant dense<0.000000e+00> : vector<2xf32>
    %109 = vector.multi_reduction <add>, %55, %cst_55 [1] : vector<2x16xf32> to vector<2xf32>
    %110 = vector.shape_cast %109 : vector<2xf32> to vector<2x1xf32>
    %cst_56 = arith.constant dense<0.000000e+00> : vector<2xf32>
    %111 = vector.multi_reduction <add>, %53, %cst_56 [1] : vector<2x8xf32> to vector<2xf32>
    %112 = vector.shape_cast %111 : vector<2xf32> to vector<2x1xf32>
    %113 = arith.addf %110, %112 : vector<2x1xf32>
    %cst_57 = arith.constant 1.000000e+00 : f32
    %114 = vector.broadcast %cst_57 : f32 to vector<2x1xf32>
    %115 = arith.maximumf %113, %114 : vector<2x1xf32>
    %116 = vector.broadcast %115 : vector<2x1xf32> to vector<2x256xf32>
    %117 = arith.divf %108, %116 : vector<2x256xf32>
    %118 = arith.truncf %117 : vector<2x256xf32> to vector<2x256xbf16>
    %c7 = arith.constant 7 : index
    %c0_58 = arith.constant 0 : index
    %c0_59 = arith.constant 0 : index
    %119 = vector.load %arg4[%c7, %c0_58, %c0_59] : memref<11x256x256xbf16, #tpu.memory_space<vmem>>, vector<1x256x256xbf16>
    %120 = vector.shape_cast %119 : vector<1x256x256xbf16> to vector<256x256xbf16>
    %cst_60 = arith.constant dense<0.000000e+00> : vector<2x256xf32>
    %121 = tpu.matmul %118, %120, %cst_60 {dimension_numbers = #tpu.dot_dimension_numbers<[1], [0], [0], [1], [0, 0, 1, 1], [], []>} : vector<2x256xbf16>, vector<256x256xbf16>, vector<2x256xf32> -> vector<2x256xf32>
    %c7_61 = arith.constant 7 : index
    %c0_62 = arith.constant 0 : index
    %122 = vector.load %arg5[%c7_61, %c0_62] : memref<16x256xf32, #tpu.memory_space<vmem>>, vector<1x256xf32>
    %123 = vector.broadcast %122 : vector<1x256xf32> to vector<2x256xf32>
    %124 = arith.addf %121, %123 : vector<2x256xf32>
    %125 = math.tanh %124 : vector<2x256xf32>
    %126 = arith.truncf %125 : vector<2x256xf32> to vector<2x256xbf16>
    %c8 = arith.constant 8 : index
    %c0_63 = arith.constant 0 : index
    %c0_64 = arith.constant 0 : index
    %127 = vector.load %arg4[%c8, %c0_63, %c0_64] : memref<11x256x256xbf16, #tpu.memory_space<vmem>>, vector<1x256x256xbf16>
    %128 = vector.shape_cast %127 : vector<1x256x256xbf16> to vector<256x256xbf16>
    %cst_65 = arith.constant dense<0.000000e+00> : vector<2x256xf32>
    %129 = tpu.matmul %126, %128, %cst_65 {dimension_numbers = #tpu.dot_dimension_numbers<[1], [0], [0], [1], [0, 0, 1, 1], [], []>} : vector<2x256xbf16>, vector<256x256xbf16>, vector<2x256xf32> -> vector<2x256xf32>
    %c8_66 = arith.constant 8 : index
    %c0_67 = arith.constant 0 : index
    %130 = vector.load %arg5[%c8_66, %c0_67] : memref<16x256xf32, #tpu.memory_space<vmem>>, vector<1x256xf32>
    %131 = vector.broadcast %130 : vector<1x256xf32> to vector<2x256xf32>
    %132 = arith.addf %129, %131 : vector<2x256xf32>
    %cst_68 = arith.constant 0.000000e+00 : f32
    %133 = vector.broadcast %cst_68 : f32 to vector<2x256xf32>
    %134 = arith.maximumf %132, %133 : vector<2x256xf32>
    %135 = arith.truncf %134 : vector<2x256xf32> to vector<2x256xbf16>
    %c9 = arith.constant 9 : index
    %c0_69 = arith.constant 0 : index
    %c0_70 = arith.constant 0 : index
    %136 = vector.load %arg4[%c9, %c0_69, %c0_70] : memref<11x256x256xbf16, #tpu.memory_space<vmem>>, vector<1x256x256xbf16>
    %137 = vector.shape_cast %136 : vector<1x256x256xbf16> to vector<256x256xbf16>
    %cst_71 = arith.constant dense<0.000000e+00> : vector<2x256xf32>
    %138 = tpu.matmul %135, %137, %cst_71 {dimension_numbers = #tpu.dot_dimension_numbers<[1], [0], [0], [1], [0, 0, 1, 1], [], []>} : vector<2x256xbf16>, vector<256x256xbf16>, vector<2x256xf32> -> vector<2x256xf32>
    %c9_72 = arith.constant 9 : index
    %c0_73 = arith.constant 0 : index
    %139 = vector.load %arg5[%c9_72, %c0_73] : memref<16x256xf32, #tpu.memory_space<vmem>>, vector<1x256xf32>
    %140 = vector.broadcast %139 : vector<1x256xf32> to vector<2x256xf32>
    %141 = arith.addf %138, %140 : vector<2x256xf32>
    %142 = arith.negf %141 : vector<2x256xf32>
    %143 = math.exp %142 : vector<2x256xf32>
    %cst_74 = arith.constant 1.000000e+00 : f32
    %144 = vector.broadcast %cst_74 : f32 to vector<2x256xf32>
    %145 = arith.addf %144, %143 : vector<2x256xf32>
    %146 = arith.divf %144, %145 : vector<2x256xf32>
    %cst_75 = arith.constant 2.000000e+00 : f32
    %147 = vector.broadcast %cst_75 : f32 to vector<2x256xf32>
    %148 = arith.mulf %146, %147 : vector<2x256xf32>
    %cst_76 = arith.constant 5.000000e-01 : f32
    %149 = vector.broadcast %cst_76 : f32 to vector<2x256xf32>
    %150 = arith.subf %148, %149 : vector<2x256xf32>
    %c0_77 = arith.constant 0 : index
    %c0_78 = arith.constant 0 : index
    %151 = vector.load %arg6[%c0_77, %c0_78] : memref<2x256xf32, #tpu.memory_space<vmem>>, vector<2x256xf32>
    tpu.vector_store %arg6[%c0_77, %c0_78], %150 {strides = array<i32>} : memref<2x256xf32, #tpu.memory_space<vmem>>, vector<2x256xf32>,
    return
  }
  func.func @transform_0(%arg0: i32) -> (i32, i32, i32) {
    %c0_i32 = arith.constant 0 : i32
    %c0_i32_0 = arith.constant 0 : i32
    %c0_i32_1 = arith.constant 0 : i32
    return %arg0, %c0_i32, %c0_i32_0 : i32, i32, i32
  }
  func.func @transform_1(%arg0: i32) -> (i32, i32, i32) {
    %c0_i32 = arith.constant 0 : i32
    %c0_i32_0 = arith.constant 0 : i32
    %c0_i32_1 = arith.constant 0 : i32
    return %arg0, %c0_i32, %c0_i32_0 : i32, i32, i32
  }
  func.func @transform_2(%arg0: i32) -> (i32, i32, i32) {
    %c0_i32 = arith.constant 0 : i32
    %c0_i32_0 = arith.constant 0 : i32
    %c0_i32_1 = arith.constant 0 : i32
    return %arg0, %c0_i32, %c0_i32_0 : i32, i32, i32
  }
  func.func @transform_3(%arg0: i32) -> (i32, i32, i32) {
    %c0_i32 = arith.constant 0 : i32
    %c0_i32_0 = arith.constant 0 : i32
    %c0_i32_1 = arith.constant 0 : i32
    %c0_i32_2 = arith.constant 0 : i32
    return %c0_i32, %c0_i32_0, %c0_i32_1 : i32, i32, i32
  }
  func.func @transform_4(%arg0: i32) -> (i32, i32) {
    %c0_i32 = arith.constant 0 : i32
    %c0_i32_0 = arith.constant 0 : i32
    %c0_i32_1 = arith.constant 0 : i32
    return %c0_i32, %c0_i32_0 : i32, i32
  }
  func.func @transform_5(%arg0: i32) -> (i32, i32) {
    %c0_i32 = arith.constant 0 : i32
    %c0_i32_0 = arith.constant 0 : i32
    return %arg0, %c0_i32 : i32, i32
  }
}

</mosaic_0001>

<bundles_post_ra>
// kernel: mgvlf_forward.1
= control target key start
LH: loop header
LB: loop body
LE: loop exit
PB: predicated region body
PF: predicated region fallthrough
CT: control target
= control target key end

     0   :  { %10 = vsyncpa [#allocation3], 0  ;;  %s4517_s0 = inlined_call_operand.vmem [shape: bf16[2,8,256], index: 0, kind: input, shape index: {}]   ;;  %s4518_s1 = inlined_call_operand.vmem [shape: bf16[2,16,256], index: 1, kind: input, shape index: {}]   ;;  %s4519_s2 = inlined_call_operand.vmem [shape: f32[2,2,128], index: 2, kind: input, shape index: {}]   ;;  %s4520_s3 = inlined_call_operand.hbm [shape: bf16[11,256,256], index: 3, kind: input, shape index: {}]   ;;  %s4521_s4 = inlined_call_operand.hbm [shape: f32[16,256], index: 4, kind: input, shape index: {}]   ;;  %s4522_s5 = inlined_call_operand.vmem [shape: f32[2,256], index: 5, kind: output, shape index: {}]  }
   0x1   :  { %11 = vsyncpa [#allocation5], 0  ;;  %s4243_s18 = smov [#allocation2]   ;;  %s4195_s22 = scalar_lea.hbm %s4520_s3, 45056 }
   0x2   :  { %s23_s19 = sshll.u32 %s4243_s18, 4  ;;  %p4196_p0 = scmp.ne.s32.totalorder %s4520_s3, %s4195_s22  ;;  %s24_s19 = int_to_ptr.vmem [resolvable:$true] %s23_s19 }
   0x3   :  { %p4199_p1 = scmp.lt.u32.totalorder %s4195_s22, %s4520_s3 }
   0x5   :  { %p4201_p2 = pnand %p4199_p1, %p4196_p0 }
   0x7   :  { %4204 = shalt.err (!%p4201_p2)
}
   0x8   :  { %s4205_s27 = scalar_lea.vmem %s24_s19, 45056  ;;  %p4210_p4 = scmp.lt.s32.totalorder %s24_s19, %s24_s19 }
   0x9   :  { %p4206_p3 = scmp.ne.s32.totalorder %s24_s19, %s4205_s27  ;;  %p4211_p5 = scmp.lt.s32.totalorder %s4205_s27, %s4205_s27 }
   0xb   :  { %p4212_p6 = por %p4211_p5, %p4210_p4 }
   0xd   :  { %p4213_p7 = pnand %p4212_p6, %p4206_p3 }
   0xf   :  { %4216 = shalt.err (!%p4213_p7)
}
  0x10   :  { %s4244_s28 = smov 128   ;;  %s4245_s29 = smov 8  }
  0x11   :  { %29 = dma.hbm_to_vmem [thread:$0]  %s4520_s3, 45056, %s24_s19, [#allocation3], %s4244_s28, %s4244_s28, %s4245_s29  }
  0x12   :  { %s4246_s7 = smov [#allocation4]   ;;  %s4217_s11 = scalar_lea.hbm %s4521_s4, 512 }
  0x13   :  { %s35_s8 = sshll.u32 %s4246_s7, 4  ;;  %p4218_p8 = scmp.ne.s32.totalorder %s4521_s4, %s4217_s11  ;;  %s36_s8 = int_to_ptr.vmem [resolvable:$true] %s35_s8 }
  0x14   :  { %p4221_p9 = scmp.lt.u32.totalorder %s4217_s11, %s4521_s4 }
  0x16   :  { %p4223_p10 = pnand %p4221_p9, %p4218_p8 }
  0x18   :  { %4226 = shalt.err (!%p4223_p10)
}
  0x19   :  { %s4227_s16 = scalar_lea.vmem %s36_s8, 512  ;;  %p4232_p12 = scmp.lt.s32.totalorder %s36_s8, %s36_s8 }
  0x1a   :  { %p4228_p11 = scmp.ne.s32.totalorder %s36_s8, %s4227_s16  ;;  %p4233_p13 = scmp.lt.s32.totalorder %s4227_s16, %s4227_s16 }
  0x1c   :  { %p4234_p0 = por %p4233_p13, %p4232_p12 }
  0x1e   :  { %p4235_p1 = pnand %p4234_p0, %p4228_p11 }
  0x20   :  { %4238 = shalt.err (!%p4235_p1)
}
  0x21   :  { %s4247_s3 = smov 256   ;;  %s4248_s17 = smov 16  }
  0x22   :  { %41 = dma.hbm_to_vmem [thread:$0]  %s4521_s4, 512, %s36_s8, [#allocation5], %s4247_s3, %s4247_s3, %s4248_s17  }
  0x23   :  { %4239 = dma.done.wait [#allocation3], 45056  }
  0x24   :  { %4240 = vsyncadd [#allocation3], 4294922240 }
  0x25   :  { %4241 = dma.done.wait [#allocation5], 512  }
  0x26   :  { %4242 = vsyncadd [#allocation5], 4294966784  ;;  %v3602_v0 = vld [vmem:[#allocation2 + $0x4] ss:$8 sps:$4 sm:$0xff]   ;;  %v3604_v1 = vld [vmem:[#allocation2] ss:$8 sps:$4 sm:$0xff]  }
  0x27   :  { %264 = vmatprep.subr.bf16.mxu0 %v3602_v0  ;;  %v3605_v2 = vld [vmem:[#allocation2 + $0x14] ss:$8 sps:$4 sm:$0xff]   ;;  %v3607_v3 = vld [vmem:[#allocation2 + $0x10] ss:$8 sps:$4 sm:$0xff]   ;;  %v3608_v4 = vld [vmem:[#allocation2 + $0x24] ss:$8 sps:$4 sm:$0xff]  }
  0x28   :  { %265 = vmatpush1.bf16.msra.mxu0 %v3604_v1  ;;  %v3610_v5 = vld [vmem:[#allocation2 + $0x20] ss:$8 sps:$4 sm:$0xff]   ;;  %v3611_v6 = vld [vmem:[#allocation2 + $0x34] ss:$8 sps:$4 sm:$0xff]   ;;  %v3613_v7 = vld [vmem:[#allocation2 + $0x30] ss:$8 sps:$4 sm:$0xff]  }
  0x29   :  { %266 = vmatprep.subr.bf16.mxu0 %v3605_v2  ;;  %v3614_v8 = vld [vmem:[#allocation2 + $0x44] ss:$8 sps:$4 sm:$0xff]   ;;  %v3616_v9 = vld [vmem:[#allocation2 + $0x40] ss:$8 sps:$4 sm:$0xff]   ;;  %v3617_v10 = vld [vmem:[#allocation2 + $0x54] ss:$8 sps:$4 sm:$0xff]  }
  0x2a   :  { %v3619_v11 = vld [vmem:[#allocation2 + $0x50] ss:$8 sps:$4 sm:$0xff]   ;;  %v3620_v12 = vld [vmem:[#allocation2 + $0x64] ss:$8 sps:$4 sm:$0xff]   ;;  %v3622_v13 = vld [vmem:[#allocation2 + $0x60] ss:$8 sps:$4 sm:$0xff]  }
  0x2b   :  { %v3623_v14 = vld [vmem:[#allocation2 + $0x74] ss:$8 sps:$4 sm:$0xff]   ;;  %v3652_v15 = vld [vmem:[%s4517_s0 + $0x4] ss:$8 sps:$4 sm:$0xff]   ;;  %v3655_v17 = vld [vmem:[#allocation2 + $0x100] ss:$8 sps:$4 sm:$0xff]  }
  0x2c   :  { %267 = vmatpush1.bf16.msra.mxu0 %v3607_v3  ;;  %v3653_v16 = vld [vmem:[#allocation2 + $0x104] ss:$8 sps:$4 sm:$0xff]   ;;  %296 = vmatprep.mubr.bf16.mxu0 %v3652_v15  ;;  %v3656_v18 = vld [vmem:[#allocation2 + $0x114] ss:$8 sps:$4 sm:$0xff]   ;;  %v3658_v19 = vld [vmem:[#allocation2 + $0x110] ss:$8 sps:$4 sm:$0xff]  }
  0x2d   :  { %268 = vmatprep.subr.bf16.mxu0 %v3608_v4  ;;  %523 = vmatprep.subr.bf16.mxu1 %v3653_v16  ;;  %v3625_v20 = vld [vmem:[#allocation2 + $0x70] ss:$8 sps:$4 sm:$0xff]   ;;  %v3659_v21 = vld [vmem:[#allocation2 + $0x124] ss:$8 sps:$4 sm:$0xff]   ;;  %v3661_v23 = vld [vmem:[#allocation2 + $0x120] ss:$8 sps:$4 sm:$0xff]  }
  0x2e   :  { %524 = vmatpush1.bf16.msra.mxu1 %v3655_v17  ;;  %v3626_v22 = vld [vmem:[#allocation2 + $0x84] ss:$8 sps:$4 sm:$0xff]   ;;  %v3628_v24 = vld [vmem:[#allocation2 + $0x80] ss:$8 sps:$4 sm:$0xff]   ;;  %v3662_v25 = vld [vmem:[#allocation2 + $0x134] ss:$8 sps:$4 sm:$0xff]  }
  0x2f   :  { %525 = vmatprep.subr.bf16.mxu1 %v3656_v18  ;;  %v3629_v26 = vld [vmem:[#allocation2 + $0x94] ss:$8 sps:$4 sm:$0xff]   ;;  %v3664_v27 = vld [vmem:[#allocation2 + $0x130] ss:$8 sps:$4 sm:$0xff]   ;;  %v3665_v29 = vld [vmem:[#allocation2 + $0x144] ss:$8 sps:$4 sm:$0xff]  }
  0x30   :  { %269 = vmatpush1.bf16.msra.mxu0 %v3610_v5  ;;  %v3631_v28 = vld [vmem:[#allocation2 + $0x90] ss:$8 sps:$4 sm:$0xff]   ;;  %v3632_v30 = vld [vmem:[#allocation2 + $0xa4] ss:$8 sps:$4 sm:$0xff]   ;;  %v3634_v31 = vld [vmem:[#allocation2 + $0xa0] ss:$8 sps:$4 sm:$0xff]  }
  0x31   :  { %270 = vmatprep.subr.bf16.mxu0 %v3611_v6  ;;  %v3667_v32 = vld [vmem:[#allocation2 + $0x140] ss:$8 sps:$4 sm:$0xff]   ;;  %v3668_v33 = vld [vmem:[#allocation2 + $0x154] ss:$8 sps:$4 sm:$0xff]   ;;  %v3670_v35 = vld [vmem:[#allocation2 + $0x150] ss:$8 sps:$4 sm:$0xff]  }
  0x32   :  { %526 = vmatpush1.bf16.msra.mxu1 %v3658_v19  ;;  %v3635_v34 = vld [vmem:[#allocation2 + $0xb4] ss:$8 sps:$4 sm:$0xff]   ;;  %v3637_v36 = vld [vmem:[#allocation2 + $0xb0] ss:$8 sps:$4 sm:$0xff]   ;;  %v3671_v37 = vld [vmem:[#allocation2 + $0x164] ss:$8 sps:$4 sm:$0xff]  }
  0x33   :  { %527 = vmatprep.subr.bf16.mxu1 %v3659_v21  ;;  %v3638_v38 = vld [vmem:[#allocation2 + $0xc4] ss:$8 sps:$4 sm:$0xff]   ;;  %v3673_v39 = vld [vmem:[#allocation2 + $0x160] ss:$8 sps:$4 sm:$0xff]   ;;  %v3674_v41 = vld [vmem:[#allocation2 + $0x174] ss:$8 sps:$4 sm:$0xff]  }
  0x34   :  { %271 = vmatpush1.bf16.msra.mxu0 %v3613_v7  ;;  %v3640_v40 = vld [vmem:[#allocation2 + $0xc0] ss:$8 sps:$4 sm:$0xff]   ;;  %v3641_v42 = vld [vmem:[#allocation2 + $0xd4] ss:$8 sps:$4 sm:$0xff]   ;;  %v3676_v43 = vld [vmem:[#allocation2 + $0x170] ss:$8 sps:$4 sm:$0xff]  }
  0x35   :  { %272 = vmatprep.subr.bf16.mxu0 %v3614_v8  ;;  %v3643_v44 = vld [vmem:[#allocation2 + $0xd0] ss:$8 sps:$4 sm:$0xff]   ;;  %v3677_v45 = vld [vmem:[#allocation2 + $0x184] ss:$8 sps:$4 sm:$0xff]   ;;  %v3679_v47 = vld [vmem:[#allocation2 + $0x180] ss:$8 sps:$4 sm:$0xff]  }
  0x36   :  { %528 = vmatpush1.bf16.msra.mxu1 %v3661_v23  ;;  %v3644_v46 = vld [vmem:[#allocation2 + $0xe4] ss:$8 sps:$4 sm:$0xff]   ;;  %v3646_v48 = vld [vmem:[#allocation2 + $0xe0] ss:$8 sps:$4 sm:$0xff]   ;;  %v3680_v49 = vld [vmem:[#allocation2 + $0x194] ss:$8 sps:$4 sm:$0xff]  }
  0x37   :  { %529 = vmatprep.subr.bf16.mxu1 %v3662_v25  ;;  %v3647_v50 = vld [vmem:[#allocation2 + $0xf4] ss:$8 sps:$4 sm:$0xff]   ;;  %v3682_v51 = vld [vmem:[#allocation2 + $0x190] ss:$8 sps:$4 sm:$0xff]   ;;  %v3683_v53 = vld [vmem:[#allocation2 + $0x1a4] ss:$8 sps:$4 sm:$0xff]  }
  0x38   :  { %273 = vmatpush1.bf16.msra.mxu0 %v3616_v9  ;;  %v3649_v52 = vld [vmem:[#allocation2 + $0xf0] ss:$8 sps:$4 sm:$0xff]   ;;  %v3650_v54 = vld [vmem:[%s4517_s0] ss:$8 sps:$4 sm:$0xff]   ;;  %v3686_v56 = vld [vmem:[#allocation2 + $0x1b4] ss:$8 sps:$4 sm:$0xff]  }
  0x39   :  { %274 = vmatprep.subr.bf16.mxu0 %v3617_v10  ;;  %v3685_v55 = vld [vmem:[#allocation2 + $0x1a0] ss:$8 sps:$4 sm:$0xff]   ;;  %v3688_v57 = vld [vmem:[#allocation2 + $0x1b0] ss:$8 sps:$4 sm:$0xff]   ;;  %v3689_v58 = vld [vmem:[#allocation2 + $0x1c4] ss:$8 sps:$4 sm:$0xff]  }
  0x3a   :  { %530 = vmatpush1.bf16.msra.mxu1 %v3664_v27  ;;  %v3691_v59 = vld [vmem:[#allocation2 + $0x1c0] ss:$8 sps:$4 sm:$0xff]   ;;  %v3692_v60 = vld [vmem:[#allocation2 + $0x1d4] ss:$8 sps:$4 sm:$0xff]   ;;  %v3694_v61 = vld [vmem:[#allocation2 + $0x1d0] ss:$8 sps:$4 sm:$0xff]  }
  0x3b   :  { %531 = vmatprep.subr.bf16.mxu1 %v3665_v29  ;;  %v3695_v62 = vld [vmem:[#allocation2 + $0x1e4] ss:$8 sps:$4 sm:$0xff]   ;;  %v3697_v63 = vld [vmem:[#allocation2 + $0x1e0] ss:$8 sps:$4 sm:$0xff]   ;;  %v3698_v0 = vld [vmem:[#allocation2 + $0x1f4] ss:$8 sps:$4 sm:$0xff]  }
  0x3c   :  { %275 = vmatpush1.bf16.msra.mxu0 %v3619_v11  ;;  %v3700_v1 = vld [vmem:[#allocation2 + $0x1f0] ss:$8 sps:$4 sm:$0xff]   ;;  %v3701_v2 = vld [vmem:[#allocation2 + $0x200] ss:$8 sps:$4 sm:$0xff]   ;;  %v3703_v3 = vld [vmem:[#allocation2 + $0x204] ss:$8 sps:$4 sm:$0xff]  }
  0x3d   :  { %276 = vmatprep.subr.bf16.mxu0 %v3620_v12  ;;  %v3706_v4 = vld [vmem:[#allocation2 + $0x214] ss:$8 sps:$4 sm:$0xff]   ;;  %v3704_v5 = vld [vmem:[#allocation2 + $0x210] ss:$8 sps:$4 sm:$0xff]   ;;  %v3709_v6 = vld [vmem:[#allocation2 + $0x224] ss:$8 sps:$4 sm:$0xff]  }
  0x3e   :  { %532 = vmatpush1.bf16.msra.mxu1 %v3667_v32  ;;  %v3707_v7 = vld [vmem:[#allocation2 + $0x220] ss:$8 sps:$4 sm:$0xff]   ;;  %v3712_v8 = vld [vmem:[#allocation2 + $0x234] ss:$8 sps:$4 sm:$0xff]   ;;  %v3710_v9 = vld [vmem:[#allocation2 + $0x230] ss:$8 sps:$4 sm:$0xff]  }
  0x3f   :  { %533 = vmatprep.subr.bf16.mxu1 %v3668_v33  ;;  %v3715_v10 = vld [vmem:[#allocation2 + $0x244] ss:$8 sps:$4 sm:$0xff]   ;;  %v3713_v11 = vld [vmem:[#allocation2 + $0x240] ss:$8 sps:$4 sm:$0xff]   ;;  %v3718_v12 = vld [vmem:[#allocation2 + $0x254] ss:$8 sps:$4 sm:$0xff]  }
  0x40   :  { %277 = vmatpush1.bf16.msra.mxu0 %v3622_v13  ;;  %v3716_v13 = vld [vmem:[#allocation2 + $0x250] ss:$8 sps:$4 sm:$0xff]   ;;  %v3719_v15 = vld [vmem:[#allocation2 + $0x260] ss:$8 sps:$4 sm:$0xff]   ;;  %v3724_v16 = vld [vmem:[#allocation2 + $0x274] ss:$8 sps:$4 sm:$0xff]  }
  0x41   :  { %278 = vmatprep.subr.bf16.mxu0 %v3623_v14  ;;  %v3721_v14 = vld [vmem:[#allocation2 + $0x264] ss:$8 sps:$4 sm:$0xff]   ;;  %v3722_v17 = vld [vmem:[#allocation2 + $0x270] ss:$8 sps:$4 sm:$0xff]   ;;  %v3725_v19 = vld [vmem:[#allocation2 + $0x280] ss:$8 sps:$4 sm:$0xff]  }
  0x42   :  { %534 = vmatpush1.bf16.msra.mxu1 %v3670_v35  ;;  %v3727_v18 = vld [vmem:[#allocation2 + $0x284] ss:$8 sps:$4 sm:$0xff]   ;;  %v3728_v21 = vld [vmem:[#allocation2 + $0x290] ss:$8 sps:$4 sm:$0xff]   ;;  %v3731_v23 = vld [vmem:[#allocation2 + $0x2a0] ss:$8 sps:$4 sm:$0xff]  }
  0x43   :  { %535 = vmatprep.subr.bf16.mxu1 %v3671_v37  ;;  %v82_v27 = vld [vmem:[#allocation4] ss:$8 sm:$0x3]  ;;  %vm1159_vm0 = vcmask 1041409   ;;  %vm1419_vm1 = vcmask 58368   ;;  %vm2392_vm2 = vcmask 1042434  }
  0x44   :  { %279 = vmatpush1.bf16.msra.mxu0 %v3625_v20  ;;  %v3730_v20 = vld [vmem:[#allocation2 + $0x294] ss:$8 sps:$4 sm:$0xff]   ;;  %vm2395_vm3 = vcmask 124929  }
  0x45   :  { %280 = vmatprep.subr.bf16.mxu0 %v3626_v22  ;;  %v3733_v22 = vld [vmem:[#allocation2 + $0x2a4] ss:$8 sps:$4 sm:$0xff]  }
  0x46   :  { %536 = vmatpush1.bf16.msra.mxu1 %v3673_v39 }
  0x47   :  { %537 = vmatprep.subr.bf16.mxu1 %v3674_v41 }
  0x48   :  { %281 = vmatpush1.bf16.msra.mxu0 %v3628_v24  ;;  %v84_v24 = vlaneseq }
  0x49   :  { %282 = vmatprep.subr.bf16.mxu0 %v3629_v26 }
  0x4a   :  { %538 = vmatpush1.bf16.msra.mxu1 %v3676_v43  ;;  %v4311_v25 = vshrl.u32 %v84_v24, 7 }
  0x4b   :  { %539 = vmatprep.subr.bf16.mxu1 %v3677_v45  ;;  %v3736_v45 = vld [vmem:[#allocation2 + $0x2b4] ss:$8 sps:$4 sm:$0xff]  }
  0x4c   :  { %283 = vmatpush1.bf16.msra.mxu0 %v3631_v28  ;;  %v4314_v26 = vsub.s32 1, %v4311_v25  ;;  %v4317_v28 = vsub.s32 0, %v4311_v25 }
  0x4d   :  { %284 = vmatprep.subr.bf16.mxu0 %v3632_v30 }
  0x4e   :  { %540 = vmatpush1.bf16.msra.mxu1 %v3679_v47  ;;  %v91_v29 = vrot.slane %v82_v27, %v4314_v26  ;;  %v87_v30 = vrot.slane %v82_v27, %v4317_v28  ;;  %v3739_v47 = vld [vmem:[#allocation2 + $0x2c4] ss:$8 sps:$4 sm:$0xff]  }
  0x4f   :  { %541 = vmatprep.subr.bf16.mxu1 %v3680_v49  ;;  %v3742_v49 = vld [vmem:[#allocation2 + $0x2d4] ss:$8 sps:$4 sm:$0xff]  }
  0x50   :  { %285 = vmatpush1.bf16.msra.mxu0 %v3634_v31 }
  0x51   :  { %286 = vmatprep.subr.bf16.mxu0 %v3635_v34 }
  0x52   :  { %542 = vmatpush1.bf16.msra.mxu1 %v3682_v51  ;;  %v3745_v51 = vld [vmem:[#allocation2 + $0x2e4] ss:$8 sps:$4 sm:$0xff]  }
  0x53   :  { %543 = vmatprep.subr.bf16.mxu1 %v3683_v53  ;;  %v3748_v53 = vld [vmem:[#allocation2 + $0x2f4] ss:$8 sps:$4 sm:$0xff]  }
  0x54   :  { %287 = vmatpush1.bf16.msra.mxu0 %v3637_v36 }
  0x55   :  { %288 = vmatprep.subr.bf16.mxu0 %v3638_v38 }
  0x56   :  { %544 = vmatpush1.bf16.msra.mxu1 %v3685_v55  ;;  %v3749_v55 = vld [vmem:[#allocation2 + $0x300] ss:$8 sps:$4 sm:$0xff]  }
  0x57   :  { %545 = vmatprep.subr.bf16.mxu1 %v3686_v56  ;;  %v3751_v56 = vld [vmem:[#allocation2 + $0x304] ss:$8 sps:$4 sm:$0xff]  }
  0x58   :  { %289 = vmatpush1.bf16.msra.mxu0 %v3640_v40 }
  0x59   :  { %290 = vmatprep.subr.bf16.mxu0 %v3641_v42 }
  0x5a   :  { %546 = vmatpush1.bf16.msra.mxu1 %v3688_v57  ;;  %v3754_v57 = vld [vmem:[#allocation2 + $0x314] ss:$8 sps:$4 sm:$0xff]  }
  0x5b   :  { %547 = vmatprep.subr.bf16.mxu1 %v3689_v58  ;;  %v3752_v58 = vld [vmem:[#allocation2 + $0x310] ss:$8 sps:$4 sm:$0xff]  }
  0x5c   :  { %291 = vmatpush1.bf16.msra.mxu0 %v3643_v44 }
  0x5d   :  { %292 = vmatprep.subr.bf16.mxu0 %v3644_v46  ;;  %v3734_v46 = vld [vmem:[#allocation2 + $0x2b0] ss:$8 sps:$4 sm:$0xff]  }
  0x5e   :  { %548 = vmatpush1.bf16.msra.mxu1 %v3691_v59  ;;  %v3757_v59 = vld [vmem:[#allocation2 + $0x324] ss:$8 sps:$4 sm:$0xff]  }
  0x5f   :  { %549 = vmatprep.subr.bf16.mxu1 %v3692_v60  ;;  %v3755_v60 = vld [vmem:[#allocation2 + $0x320] ss:$8 sps:$4 sm:$0xff]  }
  0x60   :  { %293 = vmatpush1.bf16.msra.mxu0 %v3646_v48  ;;  %v3737_v48 = vld [vmem:[#allocation2 + $0x2c0] ss:$8 sps:$4 sm:$0xff]  }
  0x61   :  { %294 = vmatprep.subr.bf16.mxu0 %v3647_v50  ;;  %v3740_v50 = vld [vmem:[#allocation2 + $0x2d0] ss:$8 sps:$4 sm:$0xff]  }
  0x62   :  { %550 = vmatpush1.bf16.msra.mxu1 %v3694_v61  ;;  %v3760_v61 = vld [vmem:[#allocation2 + $0x334] ss:$8 sps:$4 sm:$0xff]  }
  0x63   :  { %551 = vmatprep.subr.bf16.mxu1 %v3695_v62  ;;  %v3758_v62 = vld [vmem:[#allocation2 + $0x330] ss:$8 sps:$4 sm:$0xff]  }
  0x64   :  { %295 = vmatpush1.bf16.msra.mxu0 %v3649_v52  ;;  %v3743_v52 = vld [vmem:[#allocation2 + $0x2e0] ss:$8 sps:$4 sm:$0xff]  }
  0x65   :  { %782 = vmatprep.subr.bf16.mxu0 %v3703_v3  ;;  %v3769_v3 = vld [vmem:[#allocation2 + $0x364] ss:$8 sps:$4 sm:$0xff]  }
  0x66   :  { %552 = vmatpush1.bf16.msra.mxu1 %v3697_v63  ;;  %v3763_v63 = vld [vmem:[#allocation2 + $0x344] ss:$8 sps:$4 sm:$0xff]  }
  0x67   :  { %297 = vmatmul.mubr.bf16.vlgmr.msra.gmra.mrb[0].mxu0 %v3650_v54  ;;  %553 = vmatprep.subr.bf16.mxu1 %v3698_v0  ;;  %v3746_v54 = vld [vmem:[#allocation2 + $0x2f0] ss:$8 sps:$4 sm:$0xff]   ;;  %v3761_v0 = vld [vmem:[#allocation2 + $0x340] ss:$8 sps:$4 sm:$0xff]  }
  0x68   :  { %783 = vmatpush1.bf16.msra.mxu0 %v3701_v2  ;;  %v3764_v2 = vld [vmem:[#allocation2 + $0x350] ss:$8 sps:$4 sm:$0xff]  }
  0x69   :  { %784 = vmatprep.subr.bf16.mxu0 %v3706_v4  ;;  %v3767_v4 = vld [vmem:[#allocation2 + $0x360] ss:$8 sps:$4 sm:$0xff]  }
  0x6a   :  { %554 = vmatpush1.bf16.msra.mxu1 %v3700_v1  ;;  %v3766_v1 = vld [vmem:[#allocation2 + $0x354] ss:$8 sps:$4 sm:$0xff]  }
  0x6b   :  { %1041 = vmatprep.subr.bf16.mxu1 %v3751_v56  ;;  %v3853_v56 = vld [vmem:[#allocation2 + $0x404] ss:$8 sps:$4 sm:$0xff]  }
  0x6c   :  { %785 = vmatpush1.bf16.msra.mxu0 %v3704_v5  ;;  %v3772_v5 = vld [vmem:[#allocation2 + $0x374] ss:$8 sps:$4 sm:$0xff]  }
  0x6d   :  { %786 = vmatprep.subr.bf16.mxu0 %v3709_v6  ;;  %v3770_v6 = vld [vmem:[#allocation2 + $0x370] ss:$8 sps:$4 sm:$0xff]  }
  0x70   :  { %787 = vmatpush1.bf16.msra.mxu0 %v3707_v7  ;;  %v3775_v7 = vld [vmem:[#allocation2 + $0x384] ss:$8 sps:$4 sm:$0xff]  }
  0x71   :  { %788 = vmatprep.subr.bf16.mxu0 %v3712_v8  ;;  %v3773_v8 = vld [vmem:[#allocation2 + $0x380] ss:$8 sps:$4 sm:$0xff]  }
  0x74   :  { %789 = vmatpush1.bf16.msra.mxu0 %v3710_v9  ;;  %v3778_v9 = vld [vmem:[#allocation2 + $0x394] ss:$8 sps:$4 sm:$0xff]  }
  0x75   :  { %790 = vmatprep.subr.bf16.mxu0 %v3715_v10  ;;  %v3776_v10 = vld [vmem:[#allocation2 + $0x390] ss:$8 sps:$4 sm:$0xff]  }
  0x78   :  { %791 = vmatpush1.bf16.msra.mxu0 %v3713_v11  ;;  %v3781_v11 = vld [vmem:[#allocation2 + $0x3a4] ss:$8 sps:$4 sm:$0xff]  }
  0x79   :  { %792 = vmatprep.subr.bf16.mxu0 %v3718_v12  ;;  %v3779_v12 = vld [vmem:[#allocation2 + $0x3a0] ss:$8 sps:$4 sm:$0xff]  }
  0x7c   :  { %793 = vmatpush1.bf16.msra.mxu0 %v3716_v13  ;;  %v351_v13 = vld [vmem:[#allocation4 + $0x1] ss:$8 sm:$0x3] }
  0x7d   :  { %794 = vmatprep.subr.bf16.mxu0 %v3721_v14  ;;  %v356_v14 = vrot.slane %v351_v13, %v4317_v28 }
  0x80   :  { %795 = vmatpush1.bf16.msra.mxu0 %v3719_v15  ;;  %v360_v15 = vrot.slane %v351_v13, %v4314_v26 }
  0x81   :  { %796 = vmatprep.subr.bf16.mxu0 %v3724_v16 }
  0x84   :  { %797 = vmatpush1.bf16.msra.mxu0 %v3722_v17 }
  0x85   :  { %798 = vmatprep.subr.bf16.mxu0 %v3727_v18 }
  0x88   :  { %799 = vmatpush1.bf16.msra.mxu0 %v3725_v19 }
  0x89   :  { %800 = vmatprep.subr.bf16.mxu0 %v3730_v20 }
  0x8c   :  { %801 = vmatpush1.bf16.msra.mxu0 %v3728_v21 }
  0x8d   :  { %802 = vmatprep.subr.bf16.mxu0 %v3733_v22 }
  0x90   :  { %803 = vmatpush1.bf16.msra.mxu0 %v3731_v23 }
  0x91   :  { %804 = vmatprep.subr.bf16.mxu0 %v3736_v45  ;;  %v3796_v45 = vld [vmem:[#allocation2 + $0x3f4] ss:$8 sps:$4 sm:$0xff]  }
  0x94   :  { %805 = vmatpush1.bf16.msra.mxu0 %v3734_v46  ;;  %v3794_v46 = vld [vmem:[#allocation2 + $0x3f0] ss:$8 sps:$4 sm:$0xff]  }
  0x95   :  { %806 = vmatprep.subr.bf16.mxu0 %v3739_v47  ;;  %v4350_v47 = vld [vmem:[%s4519_s2] sm:$0x3] }
  0x98   :  { %807 = vmatpush1.bf16.msra.mxu0 %v3737_v48  ;;  %v4355_v48 = vld [vmem:[%s4519_s2 + $0x2] sm:$0x3] }
  0x99   :  { %808 = vmatprep.subr.bf16.mxu0 %v3742_v49  ;;  %v1416_v49 = vrot.slane %v4355_v48, 7 }
  0x9c   :  { %809 = vmatpush1.bf16.msra.mxu0 %v3740_v50  ;;  %v3799_v50 = vld [vmem:[#allocation2 + $0xa04] ss:$8 sps:$4 sm:$0xff]  }
  0x9d   :  { %810 = vmatprep.subr.bf16.mxu0 %v3745_v51  ;;  %v1382_v51 = vrot.slane %v4355_v48, %v4317_v28 }
  0x9f   :  { %1384 = vbcast.lane.b32.xlu1 %v1382_v51, 256  ;;  %v3809_v51 = vld [vmem:[#allocation2 + $0xa40] ss:$8 sps:$4 sm:$0xff]  }
  0xa0   :  { %811 = vmatpush1.bf16.msra.mxu0 %v3743_v52  ;;  %v1417_v52 = vsel %vm1159_vm0, %v1416_v49, %v4350_v47 }
  0xa1   :  { %812 = vmatprep.subr.bf16.mxu0 %v3748_v53  ;;  %v1420_v53 = vsel %vm1419_vm1, %v1417_v52, 0.0  ;;  %v3814_v52 = vld [vmem:[#allocation2 + $0xa54] ss:$8 sps:$4 sm:$0xff]  }
  0xa2   :  { %1421 = vadd.xlane.f32.xlu0 %v1420_v53  ;;  %v3812_v53 = vld [vmem:[#allocation2 + $0xa50] ss:$8 sps:$4 sm:$0xff]  }
  0xa4   :  { %813 = vmatpush1.bf16.msra.mxu0 %v3746_v54  ;;  %v1375_v54 = vrot.slane %v4350_v47, %v4317_v28 }
  0xa5   :  { %1327 = vmatprep.subr.bf16.mxu0 %v3853_v56  ;;  %v3820_v56 = vld [vmem:[#allocation2 + $0xa74] ss:$8 sps:$4 sm:$0xff]  }
  0xa6   :  { %1377 = vbcast.lane.b32.xlu1 %v1375_v54, 256  ;;  %v3817_v54 = vld [vmem:[#allocation2 + $0xa64] ss:$8 sps:$4 sm:$0xff]  }
 0x13a   :  { %v298_v31 = vpop.f32.mrb[0].mxu0 }
 0x13b   :  { %v300_v32 = vpop.f32.mrb[1].mxu0  ;;  %v299_v35 = vadd.f32 %v298_v31, %v87_v30 }
 0x13c   :  { %v301_v33 = vadd.f32 %v300_v32, %v91_v29  ;;  %v302_v34 = vpop.f32.mrb[2].mxu0 }
 0x13d   :  { %v303_v36 = vadd.f32 %v302_v34, %v87_v30  ;;  %v304_v37 = vpop.f32.mrb[3].mxu0  ;;  %v3782_v34 = vld [vmem:[#allocation2 + $0x3b0] ss:$8 sps:$4 sm:$0xff]  }
 0x13e   :  { %4139 = vtanh.f32 %v301_v33  ;;  %v305_v38 = vadd.f32 %v304_v37, %v91_v29  ;;  %v3784_v33 = vld [vmem:[#allocation2 + $0x3b4] ss:$8 sps:$4 sm:$0xff]   ;;  %v3788_v37 = vld [vmem:[#allocation2 + $0x3d0] ss:$8 sps:$4 sm:$0xff]  }
 0x13f   :  { %4141 = vtanh.f32 %v303_v36  ;;  %v3785_v36 = vld [vmem:[#allocation2 + $0x3c0] ss:$8 sps:$4 sm:$0xff]  }
 0x140   :  { %4143 = vtanh.f32 %v305_v38  ;;  %v3790_v38 = vld [vmem:[#allocation2 + $0x3d4] ss:$8 sps:$4 sm:$0xff]  }
 0x141   :  { %4145 = vtanh.f32 %v299_v35  ;;  %v3787_v35 = vld [vmem:[#allocation2 + $0x3c4] ss:$8 sps:$4 sm:$0xff]  }
 0x148   :  { %v4321_v39 = vpop.eup %4139 }
 0x149   :  { %v4323_v40 = vpop.eup %4141 }
 0x14a   :  { %v4325_v41 = vpop.eup %4143 }
 0x14b   :  { %v4327_v42 = vpop.eup %4145  ;;  %v312_v43 = vpack.c.bf16 %v4325_v41, %v4321_v39 }
 0x14c   :  { %v311_v44 = vpack.c.bf16 %v4323_v40, %v4327_v42 }
 0x14d   :  { %555 = vmatprep.mubr.bf16.mxu1 %v312_v43  ;;  %v3793_v43 = vld [vmem:[#allocation2 + $0x3e4] ss:$8 sps:$4 sm:$0xff]  }
 0x14e   :  { %556 = vmatmul.mubr.bf16.vlgmr.msra.gmra.mrb[0].mxu1 %v311_v44  ;;  %v3791_v44 = vld [vmem:[#allocation2 + $0x3e0] ss:$8 sps:$4 sm:$0xff]  }
 0x14f   :  { %1042 = vmatpush1.bf16.msra.mxu1 %v3749_v55  ;;  %v3851_v55 = vld [vmem:[#allocation2 + $0x400] ss:$8 sps:$4 sm:$0xff]  }
 0x150   :  { %1043 = vmatprep.subr.bf16.mxu1 %v3754_v57  ;;  %v3857_v57 = vld [vmem:[#allocation2 + $0x410] ss:$8 sps:$4 sm:$0xff]  }
 0x153   :  { %1044 = vmatpush1.bf16.msra.mxu1 %v3752_v58  ;;  %v3859_v58 = vld [vmem:[#allocation2 + $0x414] ss:$8 sps:$4 sm:$0xff]  }
 0x154   :  { %1045 = vmatprep.subr.bf16.mxu1 %v3757_v59  ;;  %v3863_v59 = vld [vmem:[#allocation2 + $0x420] ss:$8 sps:$4 sm:$0xff]  }
 0x157   :  { %1046 = vmatpush1.bf16.msra.mxu1 %v3755_v60  ;;  %v3865_v60 = vld [vmem:[#allocation2 + $0x424] ss:$8 sps:$4 sm:$0xff]  }
 0x158   :  { %1047 = vmatprep.subr.bf16.mxu1 %v3760_v61  ;;  %v3869_v61 = vld [vmem:[#allocation2 + $0x430] ss:$8 sps:$4 sm:$0xff]  }
 0x15b   :  { %1048 = vmatpush1.bf16.msra.mxu1 %v3758_v62  ;;  %v3871_v62 = vld [vmem:[#allocation2 + $0x434] ss:$8 sps:$4 sm:$0xff]  }
 0x15c   :  { %1049 = vmatprep.subr.bf16.mxu1 %v3763_v63  ;;  %v3875_v63 = vld [vmem:[#allocation2 + $0x440] ss:$8 sps:$4 sm:$0xff]  }
 0x15f   :  { %1050 = vmatpush1.bf16.msra.mxu1 %v3761_v0  ;;  %v3877_v0 = vld [vmem:[#allocation2 + $0x444] ss:$8 sps:$4 sm:$0xff]  }
 0x160   :  { %1051 = vmatprep.subr.bf16.mxu1 %v3766_v1  ;;  %v3881_v1 = vld [vmem:[#allocation2 + $0x450] ss:$8 sps:$4 sm:$0xff]  }
 0x163   :  { %1052 = vmatpush1.bf16.msra.mxu1 %v3764_v2  ;;  %v3883_v2 = vld [vmem:[#allocation2 + $0x454] ss:$8 sps:$4 sm:$0xff]  }
 0x164   :  { %1053 = vmatprep.subr.bf16.mxu1 %v3769_v3  ;;  %v3887_v3 = vld [vmem:[#allocation2 + $0x460] ss:$8 sps:$4 sm:$0xff]  }
 0x167   :  { %1054 = vmatpush1.bf16.msra.mxu1 %v3767_v4  ;;  %v3889_v4 = vld [vmem:[#allocation2 + $0x464] ss:$8 sps:$4 sm:$0xff]  }
 0x168   :  { %1055 = vmatprep.subr.bf16.mxu1 %v3772_v5  ;;  %v3893_v5 = vld [vmem:[#allocation2 + $0x470] ss:$8 sps:$4 sm:$0xff]  }
 0x16b   :  { %1056 = vmatpush1.bf16.msra.mxu1 %v3770_v6  ;;  %v3895_v6 = vld [vmem:[#allocation2 + $0x474] ss:$8 sps:$4 sm:$0xff]  }
 0x16c   :  { %1057 = vmatprep.subr.bf16.mxu1 %v3775_v7  ;;  %v3899_v7 = vld [vmem:[#allocation2 + $0x480] ss:$8 sps:$4 sm:$0xff]  }
 0x16f   :  { %1058 = vmatpush1.bf16.msra.mxu1 %v3773_v8  ;;  %v3901_v8 = vld [vmem:[#allocation2 + $0x484] ss:$8 sps:$4 sm:$0xff]  }
 0x170   :  { %1059 = vmatprep.subr.bf16.mxu1 %v3778_v9  ;;  %v3905_v9 = vld [vmem:[#allocation2 + $0x490] ss:$8 sps:$4 sm:$0xff]  }
 0x173   :  { %1060 = vmatpush1.bf16.msra.mxu1 %v3776_v10  ;;  %v3907_v10 = vld [vmem:[#allocation2 + $0x494] ss:$8 sps:$4 sm:$0xff]  }
 0x174   :  { %1061 = vmatprep.subr.bf16.mxu1 %v3781_v11  ;;  %v610_v11 = vld [vmem:[#allocation4 + $0x2] ss:$8 sm:$0x3] }
 0x175   :  { %v619_v13 = vrot.slane %v610_v11, %v4314_v26 }
 0x177   :  { %1062 = vmatpush1.bf16.msra.mxu1 %v3779_v12  ;;  %v615_v12 = vrot.slane %v610_v11, %v4317_v28  ;;  %v3845_v11 = vld [vmem:[%s4518_s1] ss:$8 sps:$4 sm:$0xff]  }
 0x178   :  { %1063 = vmatprep.subr.bf16.mxu1 %v3784_v33 }
 0x17b   :  { %1064 = vmatpush1.bf16.msra.mxu1 %v3782_v34 }
 0x17c   :  { %1065 = vmatprep.subr.bf16.mxu1 %v3787_v35 }
 0x17f   :  { %1066 = vmatpush1.bf16.msra.mxu1 %v3785_v36 }
 0x180   :  { %1067 = vmatprep.subr.bf16.mxu1 %v3790_v38 }
 0x183   :  { %1068 = vmatpush1.bf16.msra.mxu1 %v3788_v37 }
 0x184   :  { %1069 = vmatprep.subr.bf16.mxu1 %v3793_v43 }
 0x187   :  { %1070 = vmatpush1.bf16.msra.mxu1 %v3791_v44 }
 0x188   :  { %1071 = vmatprep.subr.bf16.mxu1 %v3796_v45  ;;  %v3808_v45 = vld [vmem:[#allocation2 + $0xa34] ss:$8 sps:$4 sm:$0xff]  }
 0x18b   :  { %1072 = vmatpush1.bf16.msra.mxu1 %v3794_v46  ;;  %v3806_v46 = vld [vmem:[#allocation2 + $0xa30] ss:$8 sps:$4 sm:$0xff]  }
 0x18c   :  { %1664 = vmatprep.subr.bf16.mxu1 %v3799_v50  ;;  %v3811_v50 = vld [vmem:[#allocation2 + $0xa44] ss:$8 sps:$4 sm:$0xff]  }
 0x221   :  { %v557_v16 = vpop.f32.mrb[0].mxu1 }
 0x222   :  { %v558_v17 = vadd.f32 %v557_v16, %v356_v14  ;;  %v559_v18 = vpop.f32.mrb[1].mxu1 }
 0x223   :  { %v560_v19 = vadd.f32 %v559_v18, %v360_v15  ;;  %v561_v20 = vpop.f32.mrb[2].mxu1 }
 0x224   :  { %4147 = vtanh.f32 %v558_v17  ;;  %v562_v21 = vadd.f32 %v561_v20, %v356_v14  ;;  %v563_v22 = vpop.f32.mrb[3].mxu1 }
 0x225   :  { %4149 = vtanh.f32 %v560_v19  ;;  %v564_v23 = vadd.f32 %v563_v22, %v360_v15 }
 0x226   :  { %4151 = vtanh.f32 %v562_v21 }
 0x227   :  { %4153 = vtanh.f32 %v564_v23 }
 0x22e   :  { %v4335_v24 = vpop.eup %4147 }
 0x22f   :  { %v4337_v27 = vpop.eup %4149  ;;  %v572_v22 = vadd.f32 %v4335_v24, %v4327_v42 }
 0x230   :  { %v4339_v29 = vpop.eup %4151 }
 0x231   :  { %v4341_v30 = vpop.eup %4153  ;;  %v570_v31 = vpack.c.bf16 %v4339_v29, %v4335_v24  ;;  %v574_v33 = vadd.f32 %v4339_v29, %v4323_v40  ;;  %v3797_v24 = vld [vmem:[#allocation2 + $0xa00] ss:$8 sps:$4 sm:$0xff]   ;;  %v3802_v40 = vld [vmem:[#allocation2 + $0xa14] ss:$8 sps:$4 sm:$0xff]   ;;  %v3800_v29 = vld [vmem:[#allocation2 + $0xa10] ss:$8 sps:$4 sm:$0xff]  }
 0x232   :  { %v571_v32 = vpack.c.bf16 %v4341_v30, %v4337_v27  ;;  %v575_v36 = vadd.f32 %v4341_v30, %v4325_v41  ;;  %v3805_v41 = vld [vmem:[#allocation2 + $0xa24] ss:$8 sps:$4 sm:$0xff]   ;;  %v3803_v30 = vld [vmem:[#allocation2 + $0xa20] ss:$8 sps:$4 sm:$0xff]  }
 0x234   :  { %814 = vmatprep.mubr.bf16.mxu0 %v571_v32 }
 0x235   :  { %815 = vmatmul.mubr.bf16.vlgmr.msra.gmra.mrb[4].mxu0 %v570_v31  ;;  %v573_v31 = vadd.f32 %v4337_v27, %v4321_v39  ;;  %v3847_v39 = vld [vmem:[%s4518_s1 + $0x4] ss:$8 sps:$4 sm:$0xff]  }
 0x236   :  { %1328 = vmatpush1.bf16.msra.mxu0 %v3851_v55  ;;  %v3815_v55 = vld [vmem:[#allocation2 + $0xa60] ss:$8 sps:$4 sm:$0xff]  }
 0x237   :  { %1329 = vmatprep.subr.bf16.mxu0 %v3859_v58  ;;  %v3823_v58 = vld [vmem:[#allocation2 + $0xa84] ss:$8 sps:$4 sm:$0xff]  }
 0x23a   :  { %1330 = vmatpush1.bf16.msra.mxu0 %v3857_v57  ;;  %v3818_v57 = vld [vmem:[#allocation2 + $0xa70] ss:$8 sps:$4 sm:$0xff]  }
 0x23b   :  { %1331 = vmatprep.subr.bf16.mxu0 %v3865_v60  ;;  %v3826_v60 = vld [vmem:[#allocation2 + $0xa94] ss:$8 sps:$4 sm:$0xff]  }
 0x23e   :  { %1332 = vmatpush1.bf16.msra.mxu0 %v3863_v59  ;;  %v3821_v59 = vld [vmem:[#allocation2 + $0xa80] ss:$8 sps:$4 sm:$0xff]  }
 0x23f   :  { %1333 = vmatprep.subr.bf16.mxu0 %v3871_v62  ;;  %v3829_v62 = vld [vmem:[#allocation2 + $0xaa4] ss:$8 sps:$4 sm:$0xff]  }
 0x242   :  { %1334 = vmatpush1.bf16.msra.mxu0 %v3869_v61  ;;  %v3824_v61 = vld [vmem:[#allocation2 + $0xa90] ss:$8 sps:$4 sm:$0xff]  }
 0x243   :  { %1335 = vmatprep.subr.bf16.mxu0 %v3877_v0  ;;  %v3832_v0 = vld [vmem:[#allocation2 + $0xab4] ss:$8 sps:$4 sm:$0xff]  }
 0x246   :  { %1336 = vmatpush1.bf16.msra.mxu0 %v3875_v63  ;;  %v3827_v63 = vld [vmem:[#allocation2 + $0xaa0] ss:$8 sps:$4 sm:$0xff]  }
 0x247   :  { %1337 = vmatprep.subr.bf16.mxu0 %v3883_v2  ;;  %v3835_v2 = vld [vmem:[#allocation2 + $0xac4] ss:$8 sps:$4 sm:$0xff]  }
 0x24a   :  { %1338 = vmatpush1.bf16.msra.mxu0 %v3881_v1  ;;  %v3830_v1 = vld [vmem:[#allocation2 + $0xab0] ss:$8 sps:$4 sm:$0xff]  }
 0x24b   :  { %1339 = vmatprep.subr.bf16.mxu0 %v3889_v4  ;;  %v3838_v4 = vld [vmem:[#allocation2 + $0xad4] ss:$8 sps:$4 sm:$0xff]  }
 0x24e   :  { %1340 = vmatpush1.bf16.msra.mxu0 %v3887_v3  ;;  %v3833_v3 = vld [vmem:[#allocation2 + $0xac0] ss:$8 sps:$4 sm:$0xff]  }
 0x24f   :  { %1341 = vmatprep.subr.bf16.mxu0 %v3895_v6  ;;  %v3841_v6 = vld [vmem:[#allocation2 + $0xae4] ss:$8 sps:$4 sm:$0xff]  }
 0x252   :  { %1342 = vmatpush1.bf16.msra.mxu0 %v3893_v5  ;;  %v3836_v5 = vld [vmem:[#allocation2 + $0xad0] ss:$8 sps:$4 sm:$0xff]  }
 0x253   :  { %1343 = vmatprep.subr.bf16.mxu0 %v3901_v8  ;;  %v3844_v8 = vld [vmem:[#allocation2 + $0xaf4] ss:$8 sps:$4 sm:$0xff]  }
 0x256   :  { %1344 = vmatpush1.bf16.msra.mxu0 %v3899_v7  ;;  %v3839_v7 = vld [vmem:[#allocation2 + $0xae0] ss:$8 sps:$4 sm:$0xff]  }
 0x257   :  { %1345 = vmatprep.subr.bf16.mxu0 %v3907_v10  ;;  %v3850_v10 = vld [vmem:[#allocation2 + $0x604] ss:$8 sps:$4 sm:$0xff]  }
 0x25a   :  { %1346 = vmatpush1.bf16.msra.mxu0 %v3905_v9  ;;  %v3842_v9 = vld [vmem:[#allocation2 + $0xaf0] ss:$8 sps:$4 sm:$0xff]  }
 0x308   :  { %v816_v14 = vpop.f32.mrb[4].mxu0 }
 0x309   :  { %v817_v15 = vadd.f32 %v816_v14, %v615_v12  ;;  %v818_v16 = vpop.f32.mrb[5].mxu0  ;;  %v3854_v14 = vld [vmem:[#allocation2 + $0x610] ss:$8 sps:$4 sm:$0xff]  }
 0x30a   :  { %v819_v17 = vadd.f32 %v818_v16, %v619_v13  ;;  %v820_v18 = vpop.f32.mrb[6].mxu0  ;;  %v3860_v16 = vld [vmem:[#allocation2 + $0x620] ss:$8 sps:$4 sm:$0xff]  }
 0x30b   :  { %4155 = vtanh.f32 %v817_v15  ;;  %v821_v19 = vadd.f32 %v820_v18, %v615_v12  ;;  %v822_v20 = vpop.f32.mrb[7].mxu0  ;;  %v3848_v12 = vld [vmem:[#allocation2 + $0x600] ss:$8 sps:$4 sm:$0xff]   ;;  %v3862_v15 = vld [vmem:[#allocation2 + $0x624] ss:$8 sps:$4 sm:$0xff]  }
 0x30c   :  { %4157 = vtanh.f32 %v819_v17  ;;  %v823_v21 = vadd.f32 %v822_v20, %v619_v13  ;;  %v3856_v13 = vld [vmem:[#allocation2 + $0x614] ss:$8 sps:$4 sm:$0xff]   ;;  %v3866_v18 = vld [vmem:[#allocation2 + $0x630] ss:$8 sps:$4 sm:$0xff]   ;;  %v3872_v20 = vld [vmem:[#allocation2 + $0x640] ss:$8 sps:$4 sm:$0xff]  }
 0x30d   :  { %4159 = vtanh.f32 %v821_v19  ;;  %v3868_v17 = vld [vmem:[#allocation2 + $0x634] ss:$8 sps:$4 sm:$0xff]   ;;  %v3874_v19 = vld [vmem:[#allocation2 + $0x644] ss:$8 sps:$4 sm:$0xff]  }
 0x30e   :  { %4161 = vtanh.f32 %v823_v21  ;;  %v3880_v21 = vld [vmem:[#allocation2 + $0x654] ss:$8 sps:$4 sm:$0xff]  }
 0x315   :  { %v4156_v23 = vpop.eup %4155 }
 0x316   :  { %v4158_v32 = vpop.eup %4157  ;;  %v4374_v34 = vadd.f32 %v4156_v23, %v572_v22  ;;  %v3878_v22 = vld [vmem:[#allocation2 + $0x650] ss:$8 sps:$4 sm:$0xff]  }
 0x317   :  { %v4160_v35 = vpop.eup %4159  ;;  %v4378_v37 = vadd.f32 %v4158_v32, %v573_v31  ;;  %v3913_v31 = vld [vmem:[#allocation2 + $0x4a4] ss:$8 sps:$4 sm:$0xff]  }
 0x318   :  { %v4162_v38 = vpop.eup %4161  ;;  %v829_v43 = vpack.c.bf16 %v4160_v35, %v4156_v23  ;;  %v4380_v44 = vadd.f32 %v4160_v35, %v574_v33  ;;  %v3886_v23 = vld [vmem:[#allocation2 + $0x664] ss:$8 sps:$4 sm:$0xff]   ;;  %v3911_v33 = vld [vmem:[#allocation2 + $0x4a0] ss:$8 sps:$4 sm:$0xff]   ;;  %v3892_v35 = vld [vmem:[#allocation2 + $0x674] ss:$8 sps:$4 sm:$0xff]   ;;  %1347 = vmatprep.subr.bf16.mxu0 %v3913_v31 }
 0x319   :  { %v830_v42 = vpack.c.bf16 %v4162_v38, %v4158_v32  ;;  %v4385_v27 = vadd.f32 %v4162_v38, %v575_v36  ;;  %v3884_v32 = vld [vmem:[#allocation2 + $0x660] ss:$8 sps:$4 sm:$0xff]   ;;  %1348 = vmatpush1.bf16.msra.mxu0 %v3911_v33  ;;  %v3919_v36 = vld [vmem:[#allocation2 + $0x4b4] ss:$8 sps:$4 sm:$0xff]   ;;  %v3890_v38 = vld [vmem:[#allocation2 + $0x670] ss:$8 sps:$4 sm:$0xff]  }
 0x31a   :  { %1349 = vmatprep.subr.bf16.mxu0 %v3919_v36 }
 0x31b   :  { %1073 = vmatprep.mubr.bf16.mxu1 %v830_v42  ;;  %v3898_v42 = vld [vmem:[#allocation2 + $0x684] ss:$8 sps:$4 sm:$0xff]  }
 0x31c   :  { %1074 = vmatmul.mubr.bf16.vlgmr.msra.gmra.mrb[4].mxu1 %v829_v43  ;;  %v3917_v43 = vld [vmem:[#allocation2 + $0x4b0] ss:$8 sps:$4 sm:$0xff]  }
 0x31d   :  { %1665 = vmatpush1.bf16.msra.mxu1 %v3797_v24  ;;  %1696 = vmatprep.mubr.bf16.mxu1 %v3847_v39  ;;  %v3925_v24 = vld [vmem:[#allocation2 + $0x4c4] ss:$8 sps:$4 sm:$0xff]   ;;  %v3896_v39 = vld [vmem:[#allocation2 + $0x680] ss:$8 sps:$4 sm:$0xff]  }
 0x31e   :  { %1666 = vmatprep.subr.bf16.mxu1 %v3802_v40  ;;  %1350 = vmatpush1.bf16.msra.mxu0 %v3917_v43  ;;  %v3923_v40 = vld [vmem:[#allocation2 + $0x4c0] ss:$8 sps:$4 sm:$0xff]  }
 0x31f   :  { %1351 = vmatprep.subr.bf16.mxu0 %v3925_v24 }
 0x321   :  { %1667 = vmatpush1.bf16.msra.mxu1 %v3800_v29  ;;  %v3904_v29 = vld [vmem:[#allocation2 + $0x694] ss:$8 sps:$4 sm:$0xff]  }
 0x322   :  { %1668 = vmatprep.subr.bf16.mxu1 %v3805_v41  ;;  %1352 = vmatpush1.bf16.msra.mxu0 %v3923_v40  ;;  %v3931_v41 = vld [vmem:[#allocation2 + $0x4d4] ss:$8 sps:$4 sm:$0xff]  }
 0x323   :  { %1353 = vmatprep.subr.bf16.mxu0 %v3931_v41 }
 0x325   :  { %1669 = vmatpush1.bf16.msra.mxu1 %v3803_v30  ;;  %v3932_v30 = vld [vmem:[%s4518_s1 + $0x14] ss:$8 sps:$4 sm:$0xff]  }
 0x326   :  { %1670 = vmatprep.subr.bf16.mxu1 %v3808_v45  ;;  %v3902_v45 = vld [vmem:[#allocation2 + $0x690] ss:$8 sps:$4 sm:$0xff]  }
 0x329   :  { %1671 = vmatpush1.bf16.msra.mxu1 %v3806_v46  ;;  %v3929_v46 = vld [vmem:[#allocation2 + $0x4d0] ss:$8 sps:$4 sm:$0xff]  }
 0x32a   :  { %1672 = vmatprep.subr.bf16.mxu1 %v3811_v50  ;;  %v3934_v50 = vld [vmem:[%s4518_s1 + $0x10] ss:$8 sps:$4 sm:$0xff]   ;;  %1354 = vmatpush1.bf16.msra.mxu0 %v3929_v46  ;;  %v3947_v46 = vld [vmem:[#allocation2 + $0x500] ss:$8 sps:$4 sm:$0xff]  }
 0x32d   :  { %1673 = vmatpush1.bf16.msra.mxu1 %v3809_v51  ;;  %v3910_v51 = vld [vmem:[#allocation2 + $0x6a4] ss:$8 sps:$4 sm:$0xff]  }
 0x32e   :  { %1674 = vmatprep.subr.bf16.mxu1 %v3814_v52  ;;  %v3940_v52 = vld [vmem:[#allocation2 + $0x4e4] ss:$8 sps:$4 sm:$0xff]  }
 0x32f   :  { %1355 = vmatprep.subr.bf16.mxu0 %v3940_v52  ;;  %v3950_v52 = vld [vmem:[#allocation2 + $0x510] ss:$8 sps:$4 sm:$0xff]  }
 0x331   :  { %1675 = vmatpush1.bf16.msra.mxu1 %v3812_v53  ;;  %v3908_v53 = vld [vmem:[#allocation2 + $0x6a0] ss:$8 sps:$4 sm:$0xff]  }
 0x332   :  { %1676 = vmatprep.subr.bf16.mxu1 %v3817_v54  ;;  %v3938_v54 = vld [vmem:[#allocation2 + $0x4e0] ss:$8 sps:$4 sm:$0xff]  }
 0x333   :  { %1356 = vmatpush1.bf16.msra.mxu0 %v3938_v54  ;;  %v3953_v54 = vld [vmem:[#allocation2 + $0x520] ss:$8 sps:$4 sm:$0xff]  }
 0x335   :  { %1677 = vmatpush1.bf16.msra.mxu1 %v3815_v55  ;;  %v3916_v55 = vld [vmem:[#allocation2 + $0x6b4] ss:$8 sps:$4 sm:$0xff]  }
 0x336   :  { %1678 = vmatprep.subr.bf16.mxu1 %v3820_v56  ;;  %v3946_v56 = vld [vmem:[#allocation2 + $0x4f4] ss:$8 sps:$4 sm:$0xff]  }
 0x337   :  { %1357 = vmatprep.subr.bf16.mxu0 %v3946_v56  ;;  %v3956_v56 = vld [vmem:[#allocation2 + $0x530] ss:$8 sps:$4 sm:$0xff]  }
 0x339   :  { %1679 = vmatpush1.bf16.msra.mxu1 %v3818_v57  ;;  %v3914_v57 = vld [vmem:[#allocation2 + $0x6b0] ss:$8 sps:$4 sm:$0xff]  }
 0x33a   :  { %1680 = vmatprep.subr.bf16.mxu1 %v3823_v58  ;;  %v3944_v58 = vld [vmem:[#allocation2 + $0x4f0] ss:$8 sps:$4 sm:$0xff]  }
 0x33b   :  { %1358 = vmatpush1.bf16.msra.mxu0 %v3944_v58  ;;  %v3959_v58 = vld [vmem:[#allocation2 + $0x540] ss:$8 sps:$4 sm:$0xff]  }
 0x33d   :  { %1681 = vmatpush1.bf16.msra.mxu1 %v3821_v59  ;;  %v3922_v59 = vld [vmem:[#allocation2 + $0x6c4] ss:$8 sps:$4 sm:$0xff]  }
 0x33e   :  { %1682 = vmatprep.subr.bf16.mxu1 %v3826_v60  ;;  %v3920_v60 = vld [vmem:[#allocation2 + $0x6c0] ss:$8 sps:$4 sm:$0xff]  }
 0x341   :  { %1683 = vmatpush1.bf16.msra.mxu1 %v3824_v61  ;;  %v3928_v61 = vld [vmem:[#allocation2 + $0x6d4] ss:$8 sps:$4 sm:$0xff]  }
 0x342   :  { %1684 = vmatprep.subr.bf16.mxu1 %v3829_v62  ;;  %v3926_v62 = vld [vmem:[#allocation2 + $0x6d0] ss:$8 sps:$4 sm:$0xff]  }
 0x345   :  { %1685 = vmatpush1.bf16.msra.mxu1 %v3827_v63  ;;  %v3937_v63 = vld [vmem:[#allocation2 + $0x6e4] ss:$8 sps:$4 sm:$0xff]  }
 0x346   :  { %1686 = vmatprep.subr.bf16.mxu1 %v3832_v0  ;;  %v3949_v0 = vld [vmem:[#allocation2 + $0x504] ss:$8 sps:$4 sm:$0xff]  }
 0x347   :  { %1925 = vmatprep.subr.bf16.mxu0 %v3949_v0  ;;  %v3968_v0 = vld [vmem:[#allocation2 + $0x570] ss:$8 sps:$4 sm:$0xff]  }
 0x349   :  { %1687 = vmatpush1.bf16.msra.mxu1 %v3830_v1  ;;  %v3935_v1 = vld [vmem:[#allocation2 + $0x6e0] ss:$8 sps:$4 sm:$0xff]  }
 0x34a   :  { %1688 = vmatprep.subr.bf16.mxu1 %v3835_v2  ;;  %v3943_v2 = vld [vmem:[#allocation2 + $0x6f4] ss:$8 sps:$4 sm:$0xff]  }
 0x34d   :  { %1689 = vmatpush1.bf16.msra.mxu1 %v3833_v3  ;;  %v3941_v3 = vld [vmem:[#allocation2 + $0x6f0] ss:$8 sps:$4 sm:$0xff]  }
 0x34e   :  { %1690 = vmatprep.subr.bf16.mxu1 %v3838_v4  ;;  %v2393_v4 = vsel %vm2392_vm2, %v1416_v49, %v4350_v47 }
 0x351   :  { %1691 = vmatpush1.bf16.msra.mxu1 %v3836_v5  ;;  %v2396_v5 = vsel %vm2395_vm3, %v2393_v4, 0.0  ;;  %v3974_v4 = vld [vmem:[#allocation2 + $0x590] ss:$8 sps:$4 sm:$0xff]  }
 0x352   :  { %1692 = vmatprep.subr.bf16.mxu1 %v3841_v6  ;;  %2397 = vadd.xlane.f32.xlu0 %v2396_v5  ;;  %v869_v6 = vld [vmem:[#allocation4 + $0x3] ss:$8 sm:$0x3]  ;;  %v3979_v5 = vld [vmem:[#allocation2 + $0x5a4] ss:$8 sps:$4 sm:$0xff]  }
 0x355   :  { %1693 = vmatpush1.bf16.msra.mxu1 %v3839_v7  ;;  %v874_v7 = vrot.slane %v869_v6, %v4317_v28 }
 0x356   :  { %1694 = vmatprep.subr.bf16.mxu1 %v3844_v8  ;;  %v878_v8 = vrot.slane %v869_v6, %v4314_v26 }
 0x359   :  { %1695 = vmatpush1.bf16.msra.mxu1 %v3842_v9 }
 0x35a   :  { %2281 = vmatprep.subr.bf16.mxu1 %v3850_v10 }
 0x35c   :  { %1697 = vmatmul.mubr.bf16.vlgmr.msra.gmra.mrb[8].mxu1 %v3845_v11 }
 0x35d   :  { %2282 = vmatpush1.bf16.msra.mxu1 %v3848_v12  ;;  %1706 = vmatprep.mubr.bf16.mxu1 %v3932_v30 }
 0x35e   :  { %2283 = vmatprep.subr.bf16.mxu1 %v3856_v13 }
 0x361   :  { %2284 = vmatpush1.bf16.msra.mxu1 %v3854_v14 }
 0x362   :  { %2285 = vmatprep.subr.bf16.mxu1 %v3862_v15 }
 0x364   :  { %1707 = vmatmul.mubr.bf16.gmra.mrb[12].mxu1 %v3934_v50 }
 0x365   :  { %2286 = vmatpush1.bf16.msra.mxu1 %v3860_v16 }
 0x366   :  { %2287 = vmatprep.subr.bf16.mxu1 %v3868_v17 }
 0x369   :  { %2288 = vmatpush1.bf16.msra.mxu1 %v3866_v18 }
 0x36a   :  { %2289 = vmatprep.subr.bf16.mxu1 %v3874_v19 }
 0x36d   :  { %2290 = vmatpush1.bf16.msra.mxu1 %v3872_v20 }
 0x36e   :  { %2291 = vmatprep.subr.bf16.mxu1 %v3880_v21 }
 0x371   :  { %2292 = vmatpush1.bf16.msra.mxu1 %v3878_v22 }
 0x372   :  { %2293 = vmatprep.subr.bf16.mxu1 %v3886_v23 }
 0x375   :  { %2294 = vmatpush1.bf16.msra.mxu1 %v3884_v32 }
 0x376   :  { %2295 = vmatprep.subr.bf16.mxu1 %v3892_v35 }
 0x379   :  { %2296 = vmatpush1.bf16.msra.mxu1 %v3890_v38 }
 0x37a   :  { %2297 = vmatprep.subr.bf16.mxu1 %v3898_v42 }
 0x37d   :  { %2298 = vmatpush1.bf16.msra.mxu1 %v3896_v39 }
 0x37e   :  { %2299 = vmatprep.subr.bf16.mxu1 %v3904_v29 }
 0x381   :  { %2300 = vmatpush1.bf16.msra.mxu1 %v3902_v45 }
 0x382   :  { %2301 = vmatprep.subr.bf16.mxu1 %v3910_v51  ;;  %v3952_v51 = vld [vmem:[#allocation2 + $0x514] ss:$8 sps:$4 sm:$0xff]  }
 0x385   :  { %2302 = vmatpush1.bf16.msra.mxu1 %v3908_v53  ;;  %v3955_v53 = vld [vmem:[#allocation2 + $0x524] ss:$8 sps:$4 sm:$0xff]  }
 0x386   :  { %2303 = vmatprep.subr.bf16.mxu1 %v3916_v55  ;;  %v3958_v55 = vld [vmem:[#allocation2 + $0x534] ss:$8 sps:$4 sm:$0xff]  }
 0x389   :  { %2304 = vmatpush1.bf16.msra.mxu1 %v3914_v57  ;;  %v3961_v57 = vld [vmem:[#allocation2 + $0x544] ss:$8 sps:$4 sm:$0xff]  }
 0x38a   :  { %2305 = vmatprep.subr.bf16.mxu1 %v3922_v59  ;;  %v3964_v59 = vld [vmem:[#allocation2 + $0x554] ss:$8 sps:$4 sm:$0xff]  }
 0x38d   :  { %2306 = vmatpush1.bf16.msra.mxu1 %v3920_v60  ;;  %v3962_v60 = vld [vmem:[#allocation2 + $0x550] ss:$8 sps:$4 sm:$0xff]  }
 0x38e   :  { %2307 = vmatprep.subr.bf16.mxu1 %v3928_v61  ;;  %v3967_v61 = vld [vmem:[#allocation2 + $0x564] ss:$8 sps:$4 sm:$0xff]  }
 0x391   :  { %2308 = vmatpush1.bf16.msra.mxu1 %v3926_v62  ;;  %v3965_v62 = vld [vmem:[#allocation2 + $0x560] ss:$8 sps:$4 sm:$0xff]  }
 0x392   :  { %2309 = vmatprep.subr.bf16.mxu1 %v3937_v63  ;;  %v3970_v63 = vld [vmem:[#allocation2 + $0x574] ss:$8 sps:$4 sm:$0xff]  }
 0x395   :  { %2310 = vmatpush1.bf16.msra.mxu1 %v3935_v1  ;;  %v3973_v1 = vld [vmem:[#allocation2 + $0x584] ss:$8 sps:$4 sm:$0xff]  }
 0x396   :  { %2311 = vmatprep.subr.bf16.mxu1 %v3943_v2  ;;  %v3971_v2 = vld [vmem:[#allocation2 + $0x580] ss:$8 sps:$4 sm:$0xff]  }
 0x399   :  { %2312 = vmatpush1.bf16.msra.mxu1 %v3941_v3  ;;  %v3976_v3 = vld [vmem:[#allocation2 + $0x594] ss:$8 sps:$4 sm:$0xff]  }
 0x3ef   :  { %v1075_v9 = vpop.f32.mrb[4].mxu1 }
 0x3f0   :  { %v1076_v10 = vadd.f32 %v1075_v9, %v874_v7  ;;  %v1077_v11 = vpop.f32.mrb[5].mxu1 }
 0x3f1   :  { %v1078_v12 = vadd.f32 %v1077_v11, %v878_v8  ;;  %v1079_v13 = vpop.f32.mrb[6].mxu1 }
 0x3f2   :  { %4163 = vtanh.f32 %v1076_v10  ;;  %v1080_v14 = vadd.f32 %v1079_v13, %v874_v7  ;;  %v1081_v15 = vpop.f32.mrb[7].mxu1  ;;  %v3977_v7 = vld [vmem:[#allocation2 + $0x5a0] ss:$8 sps:$4 sm:$0xff]  }
 0x3f3   :  { %4165 = vtanh.f32 %v1078_v12  ;;  %v1082_v16 = vadd.f32 %v1081_v15, %v878_v8  ;;  %v3982_v15 = vld [vmem:[#allocation2 + $0x5b4] ss:$8 sps:$4 sm:$0xff]  }
 0x3f4   :  { %4167 = vtanh.f32 %v1080_v14 }
 0x3f5   :  { %4169 = vtanh.f32 %v1082_v16  ;;  %v3980_v16 = vld [vmem:[#allocation2 + $0x5b0] ss:$8 sps:$4 sm:$0xff]  }
 0x3fc   :  { %v4164_v49 = vpop.eup %4163 }
 0x3fd   :  { %v4166_v17 = vpop.eup %4165  ;;  %v1090_v18 = vadd.f32 %v4164_v49, %v4374_v34  ;;  %v3588_v22 = vpack.c.bf16 %v4164_v49, %v4164_v49  ;;  %v3985_v49 = vld [vmem:[#allocation2 + $0x5c4] ss:$8 sps:$4 sm:$0xff]  }
 0x3fe   :  { %v4168_v19 = vpop.eup %4167  ;;  %v1091_v20 = vadd.f32 %v4166_v17, %v4378_v37  ;;  %v3589_v33 = vpack.c.bf16 %v4166_v17, %v4166_v17  ;;  %v3983_v17 = vld [vmem:[#allocation2 + $0x5c0] ss:$8 sps:$4 sm:$0xff]  }
 0x3ff   :  { %v4170_v21 = vpop.eup %4169  ;;  %v3590_v23 = vpack.c.bf16 %v4168_v19, %v4168_v19  ;;  %v1092_v31 = vadd.f32 %v4168_v19, %v4380_v44  ;;  %v4407_v43 = vmul.f32 0.25, %v1090_v18  ;;  %v1154_v39 = vunpack.c.l.b16 %v3588_v22  ;;  %v3988_v18 = vld [vmem:[#allocation2 + $0x5d4] ss:$8 sps:$4 sm:$0xff]   ;;  %v3986_v19 = vld [vmem:[#allocation2 + $0x5d0] ss:$8 sps:$4 sm:$0xff]  }
 0x400   :  { %v1093_v32 = vadd.f32 %v4170_v21, %v4385_v27  ;;  %v3591_v35 = vpack.c.bf16 %v4170_v21, %v4170_v21  ;;  %v4411_v34 = vmul.f32 0.25, %v1091_v20  ;;  %v1155_v27 = vunpack.c.l.b16 %v3589_v33  ;;  %v3991_v20 = vld [vmem:[#allocation2 + $0x5e4] ss:$8 sps:$4 sm:$0xff]   ;;  %v3989_v21 = vld [vmem:[#allocation2 + $0x5e0] ss:$8 sps:$4 sm:$0xff]  }
 0x401   :  { %v1156_v36 = vunpack.c.l.b16 %v3590_v23  ;;  %v4405_v38 = vmul.f32 0.25, %v1092_v31  ;;  %v3994_v22 = vld [vmem:[#allocation2 + $0x5f4] ss:$8 sps:$4 sm:$0xff]   ;;  %v3992_v23 = vld [vmem:[#allocation2 + $0x5f0] ss:$8 sps:$4 sm:$0xff]   ;;  %v4435_v31 = vpop.xlane.xlu0 %1421 }
 0x402   :  { %v4409_v42 = vmul.f32 0.25, %v1093_v32  ;;  %v1157_v24 = vunpack.c.l.b16 %v3591_v35  ;;  %v1980_v32 = vrot.slane %v4355_v48, %v4314_v26  ;;  %v3997_v33 = vld [vmem:[#allocation2 + $0x704] ss:$8 sps:$4 sm:$0xff]   ;;  %v4249_v35 = vmov 0  }
 0x403   :  { %v2073_v37 = vpack.c.bf16 %v4405_v38, %v4407_v43  ;;  %v1158_v40 = vrot.slane %v1156_v36, 7  ;;  %3600 = vset.pattern.permute.xlu1 %v4249_v35  ;;  %3601 = vset.pattern.permute.xlu0 %v4249_v35  ;;  %v2400_v36 = vrot.slane %v4435_v31, 7  ;;  %v4036_v35 = vld [vmem:[#allocation2 + $0x7d4] ss:$8 sps:$4 sm:$0xff]  }
 0x404   :  { %v2074_v44 = vpack.c.bf16 %v4409_v42, %v4411_v34  ;;  %v1161_v29 = vrot.slane %v1157_v24, 7  ;;  %1986 = vbcast.lane.b32.xlu1 %v1980_v32, 264  ;;  %v1969_v24 = vrot.slane %v4350_v47, %v4314_v26  ;;  %1982 = vbcast.lane.b32.xlu0 %v1980_v32, 256  ;;  %v4033_v32 = vld [vmem:[#allocation2 + $0x7c4] ss:$8 sps:$4 sm:$0xff]  }
 0x405   :  { %v1160_v41 = vsel %vm1159_vm0, %v1158_v40, %v1154_v39 }
 0x406   :  { %2313 = vmatprep.mubr.bf16.mxu1 %v2074_v44  ;;  %v1162_v30 = vsel %vm1159_vm0, %v1161_v29, %v1155_v27  ;;  %v1163_v50 = vpack.c.b16 %v1160_v41, %v1160_v41  ;;  %v1138_v44 = vld [vmem:[#allocation4 + $0x4] ss:$8 sm:$0x3] }
 0x407   :  { %2314 = vmatmul.mubr.bf16.vlgmr.msra.gmra.mrb[16].mxu1 %v2073_v37  ;;  %v1164_v45 = vpack.c.b16 %v1162_v30, %v1162_v30  ;;  %v2398_v37 = vpop.xlane.xlu0 %2397  ;;  %v1143_v27 = vrot.slane %v1138_v44, %v4317_v28  ;;  %v1147_v41 = vrot.slane %v1138_v44, %v4314_v26  ;;  %v4043_v44 = vld [vmem:[#allocation2 + $0x800] ss:$8 sps:$4 sm:$0xff]  }
 0x408   :  { %1971 = vbcast.lane.b32.xlu1 %v1969_v24, 256  ;;  %v2402_v39 = vadd.f32 %v2400_v36, %v2398_v37  ;;  %v4034_v36 = vld [vmem:[#allocation2 + $0x7d0] ss:$8 sps:$4 sm:$0xff]   ;;  %v4039_v37 = vld [vmem:[#allocation2 + $0x7e4] ss:$8 sps:$4 sm:$0xff]  }
 0x409   :  { %1359 = vmatprep.mubr.bf16.mxu0 %v1164_v45 }
 0x40a   :  { %1360 = vmatmul.mubr.bf16.vlgmr.msra.gmra.mrb[8].mxu0 %v1163_v50  ;;  %v2403_v40 = vmax.f32 %v2402_v39, 1.0  ;;  %v4042_v39 = vld [vmem:[#allocation2 + $0x7f4] ss:$8 sps:$4 sm:$0xff]  }
 0x40b   :  { %1926 = vmatpush1.bf16.msra.mxu0 %v3947_v46 }
 0x40c   :  { %1927 = vmatprep.subr.bf16.mxu0 %v3952_v51  ;;  %1975 = vbcast.lane.b32.xlu1 %v1969_v24, 264  ;;  %v4037_v24 = vld [vmem:[#allocation2 + $0x7e0] ss:$8 sps:$4 sm:$0xff]  }
 0x40f   :  { %1928 = vmatpush1.bf16.msra.mxu0 %v3950_v52 }
 0x410   :  { %1929 = vmatprep.subr.bf16.mxu0 %v3955_v53  ;;  %2406 = vperm.xlu1 %3600, %v2403_v40   ;;  %v4040_v40 = vld [vmem:[#allocation2 + $0x7f0] ss:$8 sps:$4 sm:$0xff]  }
 0x413   :  { %1930 = vmatpush1.bf16.msra.mxu0 %v3953_v54 }
 0x414   :  { %1931 = vmatprep.subr.bf16.mxu0 %v3958_v55 }
 0x417   :  { %1932 = vmatpush1.bf16.msra.mxu0 %v3956_v56 }
 0x418   :  { %1933 = vmatprep.subr.bf16.mxu0 %v3961_v57  ;;  %v3995_v57 = vld [vmem:[#allocation2 + $0x700] ss:$8 sps:$4 sm:$0xff]  }
 0x41b   :  { %1934 = vmatpush1.bf16.msra.mxu0 %v3959_v58 }
 0x41c   :  { %1935 = vmatprep.subr.bf16.mxu0 %v3964_v59  ;;  %v4000_v59 = vld [vmem:[#allocation2 + $0x714] ss:$8 sps:$4 sm:$0xff]  }
 0x41f   :  { %1936 = vmatpush1.bf16.msra.mxu0 %v3962_v60  ;;  %v3998_v60 = vld [vmem:[#allocation2 + $0x710] ss:$8 sps:$4 sm:$0xff]  }
 0x420   :  { %1937 = vmatprep.subr.bf16.mxu0 %v3967_v61  ;;  %v4003_v61 = vld [vmem:[#allocation2 + $0x724] ss:$8 sps:$4 sm:$0xff]  }
 0x423   :  { %1938 = vmatpush1.bf16.msra.mxu0 %v3965_v62  ;;  %v4001_v62 = vld [vmem:[#allocation2 + $0x720] ss:$8 sps:$4 sm:$0xff]  }
 0x424   :  { %1939 = vmatprep.subr.bf16.mxu0 %v3970_v63  ;;  %v4006_v63 = vld [vmem:[#allocation2 + $0x734] ss:$8 sps:$4 sm:$0xff]  }
 0x427   :  { %1940 = vmatpush1.bf16.msra.mxu0 %v3968_v0  ;;  %v4004_v0 = vld [vmem:[#allocation2 + $0x730] ss:$8 sps:$4 sm:$0xff]  }
 0x428   :  { %1941 = vmatprep.subr.bf16.mxu0 %v3973_v1  ;;  %v4009_v1 = vld [vmem:[#allocation2 + $0x744] ss:$8 sps:$4 sm:$0xff]  }
 0x42b   :  { %1942 = vmatpush1.bf16.msra.mxu0 %v3971_v2  ;;  %v4007_v2 = vld [vmem:[#allocation2 + $0x740] ss:$8 sps:$4 sm:$0xff]  }
 0x42c   :  { %1943 = vmatprep.subr.bf16.mxu0 %v3976_v3  ;;  %v4012_v3 = vld [vmem:[#allocation2 + $0x754] ss:$8 sps:$4 sm:$0xff]  }
 0x42f   :  { %v4419_v6 = vpop.f32.mrb[8].mxu1  ;;  %1944 = vmatpush1.bf16.msra.mxu0 %v3974_v4  ;;  %v4010_v4 = vld [vmem:[#allocation2 + $0x750] ss:$8 sps:$4 sm:$0xff]  }
 0x430   :  { %v4421_v8 = vpop.f32.mrb[9].mxu1  ;;  %1945 = vmatprep.subr.bf16.mxu0 %v3979_v5  ;;  %v4015_v5 = vld [vmem:[#allocation2 + $0x764] ss:$8 sps:$4 sm:$0xff]  }
 0x431   :  { %v4423_v9 = vpop.f32.mrb[10].mxu1 }
 0x432   :  { %v4425_v10 = vpop.f32.mrb[11].mxu1 }
 0x433   :  { %1946 = vmatpush1.bf16.msra.mxu0 %v3977_v7  ;;  %v4013_v7 = vld [vmem:[#allocation2 + $0x760] ss:$8 sps:$4 sm:$0xff]  }
 0x434   :  { %1947 = vmatprep.subr.bf16.mxu0 %v3982_v15  ;;  %v4018_v15 = vld [vmem:[#allocation2 + $0x774] ss:$8 sps:$4 sm:$0xff]  }
 0x437   :  { %v4427_v11 = vpop.f32.mrb[12].mxu1  ;;  %1948 = vmatpush1.bf16.msra.mxu0 %v3980_v16  ;;  %v4016_v16 = vld [vmem:[#allocation2 + $0x770] ss:$8 sps:$4 sm:$0xff]  }
 0x438   :  { %v4429_v12 = vpop.f32.mrb[13].mxu1  ;;  %1949 = vmatprep.subr.bf16.mxu0 %v3985_v49  ;;  %v4021_v49 = vld [vmem:[#allocation2 + $0x784] ss:$8 sps:$4 sm:$0xff]  }
 0x439   :  { %v4431_v13 = vpop.f32.mrb[14].mxu1 }
 0x43a   :  { %v4433_v14 = vpop.f32.mrb[15].mxu1 }
 0x43b   :  { %1950 = vmatpush1.bf16.msra.mxu0 %v3983_v17  ;;  %v4019_v17 = vld [vmem:[#allocation2 + $0x780] ss:$8 sps:$4 sm:$0xff]  }
 0x43c   :  { %1951 = vmatprep.subr.bf16.mxu0 %v3988_v18  ;;  %v4024_v18 = vld [vmem:[#allocation2 + $0x794] ss:$8 sps:$4 sm:$0xff]  }
 0x43f   :  { %1952 = vmatpush1.bf16.msra.mxu0 %v3986_v19  ;;  %v4022_v19 = vld [vmem:[#allocation2 + $0x790] ss:$8 sps:$4 sm:$0xff]  }
 0x440   :  { %1953 = vmatprep.subr.bf16.mxu0 %v3991_v20  ;;  %v4027_v20 = vld [vmem:[#allocation2 + $0x7a4] ss:$8 sps:$4 sm:$0xff]  }
 0x443   :  { %1954 = vmatpush1.bf16.msra.mxu0 %v3989_v21  ;;  %v4025_v21 = vld [vmem:[#allocation2 + $0x7a0] ss:$8 sps:$4 sm:$0xff]  }
 0x444   :  { %1955 = vmatprep.subr.bf16.mxu0 %v3994_v22  ;;  %v4030_v22 = vld [vmem:[#allocation2 + $0x7b4] ss:$8 sps:$4 sm:$0xff]  }
 0x447   :  { %1956 = vmatpush1.bf16.msra.mxu0 %v3992_v23  ;;  %v4028_v23 = vld [vmem:[#allocation2 + $0x7b0] ss:$8 sps:$4 sm:$0xff]  }
 0x448   :  { %2644 = vmatprep.subr.bf16.mxu0 %v3997_v33  ;;  %v4031_v33 = vld [vmem:[#allocation2 + $0x7c0] ss:$8 sps:$4 sm:$0xff]  }
 0x4da   :  { %v4442_v48 = vpop.f32.mrb[16].mxu1 }
 0x4db   :  { %v4445_v29 = vpop.f32.mrb[17].mxu1 }
 0x4dc   :  { %v4448_v30 = vpop.f32.mrb[18].mxu1 }
 0x4dd   :  { %v1361_v47 = vpop.f32.mrb[8].mxu0  ;;  %v4450_v45 = vpop.f32.mrb[19].mxu1 }
 0x4de   :  { %v1362_v46 = vadd.f32 %v1361_v47, %v1143_v27  ;;  %v1363_v50 = vpop.f32.mrb[9].mxu0  ;;  %v4045_v27 = vld [vmem:[#allocation2 + $0x804] ss:$8 sps:$4 sm:$0xff]   ;;  %v4046_v47 = vld [vmem:[#allocation2 + $0x810] ss:$8 sps:$4 sm:$0xff]  }
 0x4df   :  { %v1364_v51 = vadd.f32 %v1363_v50, %v1147_v41  ;;  %v1365_v52 = vpop.f32.mrb[10].mxu0  ;;  %v4048_v41 = vld [vmem:[#allocation2 + $0x814] ss:$8 sps:$4 sm:$0xff]   ;;  %2895 = vmatprep.subr.bf16.mxu1 %v4045_v27  ;;  %v4049_v50 = vld [vmem:[#allocation2 + $0x820] ss:$8 sps:$4 sm:$0xff]  }
 0x4e0   :  { %4171 = vtanh.f32 %v1362_v46  ;;  %v1366_v53 = vpop.f32.mrb[11].mxu0  ;;  %2896 = vmatpush1.bf16.msra.mxu1 %v4043_v44  ;;  %v4051_v46 = vld [vmem:[#allocation2 + $0x824] ss:$8 sps:$4 sm:$0xff]   ;;  %v4052_v52 = vld [vmem:[#allocation2 + $0x830] ss:$8 sps:$4 sm:$0xff]  }
 0x4e1   :  { %4173 = vtanh.f32 %v1364_v51  ;;  %2897 = vmatprep.subr.bf16.mxu1 %v4048_v41  ;;  %v4054_v51 = vld [vmem:[#allocation2 + $0x834] ss:$8 sps:$4 sm:$0xff]   ;;  %v4057_v53 = vld [vmem:[#allocation2 + $0x844] ss:$8 sps:$4 sm:$0xff]  }
 0x4e4   :  { %2898 = vmatpush1.bf16.msra.mxu1 %v4046_v47 }
 0x4e5   :  { %2899 = vmatprep.subr.bf16.mxu1 %v4051_v46 }
 0x4e8   :  { %2900 = vmatpush1.bf16.msra.mxu1 %v4049_v50 }
 0x4e9   :  { %2901 = vmatprep.subr.bf16.mxu1 %v4054_v51 }
 0x4ea   :  { %v4172_v54 = vpop.eup %4171 }
 0x4eb   :  { %v4174_v55 = vpop.eup %4173  ;;  %v1717_v58 = vpack.c.bf16 %v4172_v54, %v4172_v54  ;;  %v4055_v54 = vld [vmem:[#allocation2 + $0x840] ss:$8 sps:$4 sm:$0xff]  }
 0x4ec   :  { %v1718_v56 = vpack.c.bf16 %v4174_v55, %v4174_v55  ;;  %2902 = vmatpush1.bf16.msra.mxu1 %v4052_v52  ;;  %v4060_v55 = vld [vmem:[#allocation2 + $0x854] ss:$8 sps:$4 sm:$0xff]  }
 0x4ed   :  { %2903 = vmatprep.subr.bf16.mxu1 %v4057_v53  ;;  %v1753_v53 = vld [vmem:[#allocation4 + $0x5] ss:$8 sm:$0x3] }
 0x4ee   :  { %1957 = vmatprep.mubr.bf16.mxu0 %v1718_v56  ;;  %v4058_v56 = vld [vmem:[#allocation2 + $0x850] ss:$8 sps:$4 sm:$0xff]  }
 0x4ef   :  { %1958 = vmatmul.mubr.bf16.vlgmr.msra.gmra.mrb[12].mxu0 %v1717_v58  ;;  %v4061_v58 = vld [vmem:[#allocation2 + $0x860] ss:$8 sps:$4 sm:$0xff]  }
 0x4f0   :  { %2645 = vmatpush1.bf16.msra.mxu0 %v3995_v57  ;;  %2904 = vmatpush1.bf16.msra.mxu1 %v4055_v54  ;;  %v4063_v57 = vld [vmem:[#allocation2 + $0x864] ss:$8 sps:$4 sm:$0xff]   ;;  %v4250_v54 = vmov 1966171168  }
 0x4f1   :  { %2646 = vmatprep.subr.bf16.mxu0 %v4000_v59  ;;  %2905 = vmatprep.subr.bf16.mxu1 %v4060_v55  ;;  %v4066_v59 = vld [vmem:[#allocation2 + $0x874] ss:$8 sps:$4 sm:$0xff]   ;;  %v2000_v55 = vunpack.c.l.s4 %v4250_v54 }
 0x4f4   :  { %2647 = vmatpush1.bf16.msra.mxu0 %v3998_v60  ;;  %2906 = vmatpush1.bf16.msra.mxu1 %v4058_v56  ;;  %v4064_v60 = vld [vmem:[#allocation2 + $0x870] ss:$8 sps:$4 sm:$0xff]  }
 0x4f5   :  { %2648 = vmatprep.subr.bf16.mxu0 %v4003_v61  ;;  %2907 = vmatprep.subr.bf16.mxu1 %v4063_v57  ;;  %v4069_v61 = vld [vmem:[#allocation2 + $0x884] ss:$8 sps:$4 sm:$0xff]  }
 0x4f8   :  { %2649 = vmatpush1.bf16.msra.mxu0 %v4001_v62  ;;  %2908 = vmatpush1.bf16.msra.mxu1 %v4061_v58  ;;  %v4067_v62 = vld [vmem:[#allocation2 + $0x880] ss:$8 sps:$4 sm:$0xff]  }
 0x4f9   :  { %2650 = vmatprep.subr.bf16.mxu0 %v4006_v63  ;;  %2909 = vmatprep.subr.bf16.mxu1 %v4066_v59  ;;  %v4072_v63 = vld [vmem:[#allocation2 + $0x894] ss:$8 sps:$4 sm:$0xff]  }
 0x4fc   :  { %2651 = vmatpush1.bf16.msra.mxu0 %v4004_v0  ;;  %2910 = vmatpush1.bf16.msra.mxu1 %v4064_v60  ;;  %v4070_v0 = vld [vmem:[#allocation2 + $0x890] ss:$8 sps:$4 sm:$0xff]  }
 0x4fd   :  { %2652 = vmatprep.subr.bf16.mxu0 %v4009_v1  ;;  %2911 = vmatprep.subr.bf16.mxu1 %v4069_v61  ;;  %v4075_v1 = vld [vmem:[#allocation2 + $0x8a4] ss:$8 sps:$4 sm:$0xff]  }
 0x500   :  { %2653 = vmatpush1.bf16.msra.mxu0 %v4007_v2  ;;  %2912 = vmatpush1.bf16.msra.mxu1 %v4067_v62  ;;  %v4073_v2 = vld [vmem:[#allocation2 + $0x8a0] ss:$8 sps:$4 sm:$0xff]  }
 0x501   :  { %2654 = vmatprep.subr.bf16.mxu0 %v4012_v3  ;;  %2913 = vmatprep.subr.bf16.mxu1 %v4072_v63  ;;  %v4078_v3 = vld [vmem:[#allocation2 + $0x8b4] ss:$8 sps:$4 sm:$0xff]  }
 0x504   :  { %2655 = vmatpush1.bf16.msra.mxu0 %v4010_v4  ;;  %2914 = vmatpush1.bf16.msra.mxu1 %v4070_v0  ;;  %v4452_v4 = vpop.permute.xlu1 %1384  ;;  %v1758_v0 = vrot.slane %v1753_v53, %v4317_v28 }
 0x505   :  { %2656 = vmatprep.subr.bf16.mxu0 %v4015_v5  ;;  %2915 = vmatprep.subr.bf16.mxu1 %v4075_v1  ;;  %v4076_v5 = vld [vmem:[#allocation2 + $0x8b0] ss:$8 sps:$4 sm:$0xff]  }
 0x506   :  { %v1472_v1 = vld [vmem:[#allocation4 + $0x12] ss:$8 sm:$0x3] }
 0x508   :  { %2657 = vmatpush1.bf16.msra.mxu0 %v4013_v7  ;;  %2916 = vmatpush1.bf16.msra.mxu1 %v4073_v2  ;;  %v1378_v7 = vpop.permute.xlu1 %1377  ;;  %v2001_v2 = vunpack.c.0.s8 %v2000_v55 }
 0x509   :  { %2658 = vmatprep.subr.bf16.mxu0 %v4018_v15  ;;  %2917 = vmatprep.subr.bf16.mxu1 %v4078_v3  ;;  %v1386_v15 = vmul.f32 %v1378_v7, %v4407_v43 }
 0x50c   :  { %2659 = vmatpush1.bf16.msra.mxu0 %v4016_v16  ;;  %2918 = vmatpush1.bf16.msra.mxu1 %v4076_v5  ;;  %v1388_v16 = vmul.f32 %v4452_v4, %v4405_v38  ;;  %v2109_v38 = vld [vmem:[#allocation4 + $0x6] ss:$8 sm:$0x3]  ;;  %v4464_v52 = vpop.permute.xlu1 %1986 }
 0x50d   :  { %2660 = vmatprep.subr.bf16.mxu0 %v4021_v49  ;;  %v1387_v49 = vmul.f32 %v1378_v7, %v4411_v34  ;;  %v2114_v44 = vrot.slane %v2109_v38, %v4317_v28 }
 0x50f   :  { %v2316_v50 = vadd.f32 %v4442_v48, %v2114_v44  ;;  %v2320_v63 = vadd.f32 %v4448_v30, %v2114_v44  ;;  %v1762_v48 = vrot.slane %v1753_v53, %v4314_v26  ;;  %v1481_v30 = vrot.slane %v1472_v1, %v4314_v26 }
 0x510   :  { %2661 = vmatpush1.bf16.msra.mxu0 %v4019_v17  ;;  %v1389_v17 = vmul.f32 %v4452_v4, %v4409_v42 }
 0x511   :  { %2662 = vmatprep.subr.bf16.mxu0 %v4024_v18  ;;  %v1390_v18 = vrot.slane %v1386_v15, 4  ;;  %v2360_v60 = vmul.f32 %v2316_v50, %v1378_v7  ;;  %v1715_v50 = vadd.f32 %v4433_v14, %v1481_v30 }
 0x514   :  { %2663 = vmatpush1.bf16.msra.mxu0 %v4022_v19  ;;  %v1402_v19 = vrot.slane %v1388_v16, 4 }
 0x515   :  { %2664 = vmatprep.subr.bf16.mxu0 %v4027_v20  ;;  %v1396_v20 = vrot.slane %v1387_v49, 4 }
 0x518   :  { %2665 = vmatpush1.bf16.msra.mxu0 %v4025_v21  ;;  %v1408_v21 = vrot.slane %v1389_v17, 4 }
 0x519   :  { %2666 = vmatprep.subr.bf16.mxu0 %v4030_v22  ;;  %v1391_v22 = vadd.f32 %v1390_v18, %v1386_v15 }
 0x51c   :  { %2667 = vmatpush1.bf16.msra.mxu0 %v4028_v23  ;;  %v1423_v23 = vmax.f32 %v4435_v31, 1.0  ;;  %v2118_v31 = vrot.slane %v2109_v38, %v4314_v26 }
 0x51d   :  { %2668 = vmatprep.subr.bf16.mxu0 %v4033_v32  ;;  %v1403_v32 = vadd.f32 %v1402_v19, %v1388_v16 }
 0x51e   :  { %v1425_v43 = vrot.slane %v1423_v23, 1  ;;  %4175 = vrcp.f32 %v1423_v23  ;;  %v2318_v57 = vadd.f32 %v4445_v29, %v2118_v31  ;;  %v2322_v16 = vadd.f32 %v4450_v45, %v2118_v31 }
 0x51f   :  { %v2364_v29 = vrot.slane %v2360_v60, 4 }
 0x520   :  { %2669 = vmatpush1.bf16.msra.mxu0 %v4031_v33  ;;  %v1397_v33 = vadd.f32 %v1396_v20, %v1387_v49  ;;  %4177 = vrcp.f32 %v1425_v43  ;;  %v2361_v15 = vmul.f32 %v2318_v57, %v1378_v7  ;;  %v1477_v20 = vrot.slane %v1472_v1, %v4317_v28 }
 0x521   :  { %2670 = vmatprep.subr.bf16.mxu0 %v4036_v35  ;;  %v1409_v35 = vadd.f32 %v1408_v21, %v1389_v17  ;;  %v4471_v17 = vpop.permute.xlu1 %1971  ;;  %v2362_v21 = vmul.f32 %v2320_v63, %v4452_v4 }
 0x522   :  { %v2370_v45 = vrot.slane %v2361_v15, 4 }
 0x523   :  { %v2376_v44 = vrot.slane %v2362_v21, 4 }
 0x524   :  { %2671 = vmatpush1.bf16.msra.mxu0 %v4034_v36  ;;  %v1392_v36 = vrot.slane %v1391_v22, 2 }
 0x525   :  { %2672 = vmatprep.subr.bf16.mxu0 %v4039_v37  ;;  %v1398_v37 = vrot.slane %v1397_v33, 2  ;;  %v2377_v55 = vadd.f32 %v2376_v44, %v2362_v21 }
 0x526   :  { %v1393_v34 = vadd.f32 %v1392_v36, %v1391_v22  ;;  %v2363_v36 = vmul.f32 %v2322_v16, %v4452_v4  ;;  %v1709_v4 = vadd.f32 %v4427_v11, %v1477_v20 }
 0x528   :  { %2673 = vmatpush1.bf16.msra.mxu0 %v4037_v24  ;;  %v1404_v24 = vrot.slane %v1403_v32, 2  ;;  %v1394_v41 = vrot.slane %v1393_v34, 1  ;;  %v4176_v58 = vpop.eup %4175  ;;  %v2382_v53 = vrot.slane %v2363_v36, 4 }
 0x529   :  { %2674 = vmatprep.subr.bf16.mxu0 %v4042_v39  ;;  %v1410_v39 = vrot.slane %v1409_v35, 2 }
 0x52a   :  { %v1405_v42 = vadd.f32 %v1404_v24, %v1403_v32  ;;  %v1395_v56 = vadd.f32 %v1394_v41, %v1393_v34  ;;  %v4178_v62 = vpop.eup %4177  ;;  %v1976_v41 = vpop.permute.xlu1 %1975 }
 0x52b   :  { %v1411_v27 = vadd.f32 %v1410_v39, %v1409_v35 }
 0x52c   :  { %2675 = vmatpush1.bf16.msra.mxu0 %v4040_v40  ;;  %v1399_v40 = vadd.f32 %v1398_v37, %v1397_v33  ;;  %v1406_v47 = vrot.slane %v1405_v42, 1  ;;  %v1429_v5 = vmul.f32 %v4176_v58, %v1395_v56  ;;  %v2004_v33 = vsub.s32 %v2001_v2, %v4311_v25 }
 0x52d   :  { %v1412_v51 = vrot.slane %v1411_v27, 1  ;;  %v4479_v37 = vadd.f32 %v2364_v29, %v2360_v60  ;;  %v1703_v25 = vadd.f32 %v4423_v9, %v1477_v20 }
 0x52e   :  { %v1400_v46 = vrot.slane %v1399_v40, 1  ;;  %v1407_v61 = vadd.f32 %v1406_v47, %v1405_v42  ;;  %v2052_v43 = vrot.slane %v1429_v5, %v4317_v28  ;;  %v1699_v42 = vadd.f32 %v4419_v6, %v1477_v20 }
 0x52f   :  { %v1413_v3 = vadd.f32 %v1412_v51, %v1411_v27  ;;  %v1705_v27 = vadd.f32 %v4425_v10, %v1481_v30  ;;  %v2371_v51 = vadd.f32 %v2370_v45, %v2361_v15  ;;  %v1711_v6 = vadd.f32 %v4429_v12, %v1481_v30 }
 0x530   :  { %v1401_v59 = vadd.f32 %v1400_v46, %v1399_v40  ;;  %v1432_v19 = vmul.f32 %v4178_v62, %v1407_v61  ;;  %v1701_v40 = vadd.f32 %v4421_v8, %v1481_v30  ;;  %v1713_v46 = vadd.f32 %v4431_v13, %v1477_v20 }
 0x531   :  { %v1433_v35 = vmul.f32 %v4178_v62, %v1413_v3  ;;  %v2366_v8 = vrot.slane %v4479_v37, 2  ;;  %v1988_v10 = vmul.f32 %v4471_v17, %v1699_v42  ;;  %v1990_v56 = vmul.f32 %v1976_v41, %v1703_v25 }
 0x532   :  { %v1430_v49 = vmul.f32 %v4176_v58, %v1401_v59  ;;  %v2060_v34 = vrot.slane %v1432_v19, %v4317_v28  ;;  %v1989_v11 = vmul.f32 %v4471_v17, %v1701_v40  ;;  %v1991_v57 = vmul.f32 %v1976_v41, %v1705_v27  ;;  %v1983_v59 = vpop.permute.xlu0 %1982 }
 0x533   :  { %v2064_v47 = vrot.slane %v1433_v35, %v4317_v28  ;;  %v2372_v60 = vrot.slane %v2371_v51, 2  ;;  %v2383_v61 = vadd.f32 %v2382_v53, %v2363_v36  ;;  %v1994_v12 = vmul.f32 %v4464_v52, %v1713_v46 }
 0x534   :  { %v2056_v39 = vrot.slane %v1430_v49, %v4317_v28  ;;  %v1995_v62 = vmul.f32 %v4464_v52, %v1715_v50  ;;  %v1992_v2 = vmul.f32 %v1983_v59, %v1709_v4  ;;  %v1993_v3 = vmul.f32 %v1983_v59, %v1711_v6 }
 0x535   :  { %v2367_v27 = vadd.f32 %v2366_v8, %v4479_v37  ;;  %v2378_v4 = vrot.slane %v2377_v55, 2  ;;  %v2373_v46 = vadd.f32 %v2372_v60, %v2371_v51 }
 0x537   :  { %v2374_v8 = vrot.slane %v2373_v46, 1 }
 0x5c2   :  { %v1959_v18 = vpop.f32.mrb[12].mxu0 }
 0x5c3   :  { %v1960_v22 = vadd.f32 %v1959_v18, %v1758_v0  ;;  %v1961_v23 = vpop.f32.mrb[13].mxu0 }
 0x5c4   :  { %v1962_v32 = vadd.f32 %v1961_v23, %v1762_v48  ;;  %v1963_v7 = vpop.f32.mrb[14].mxu0 }
 0x5c5   :  { %v1964_v24 = vpop.f32.mrb[15].mxu0 }
 0x5c6   :  { %v1998_v38 = vcombine.low %v1960_v22, %v1962_v32  ;;  %v2407_v22 = vpop.permute.xlu1 %2406 }
 0x5c7   :  { %v2408_v40 = vrot.slane %v2407_v22, 1 }
 0x5c8   :  { %v2005_v31 = vrot.slane %v1998_v38, %v2004_v33 }
 0x5c9   :  { %4179 = vrcp.f32 %v2408_v40 }
 0x5ca   :  { %v2006_v9 = vcombine.high %v2005_v31, %v2005_v31  ;;  %v2013_v54 = vrot.slane %v2005_v31, %v2004_v33 }
 0x5cc   :  { %v2020_v58 = vrot.slane %v2006_v9, %v2004_v33  ;;  %v2024_v13 = vrot.slane %v2013_v54, %v4317_v28  ;;  %v2028_v14 = vrot.slane %v2013_v54, %v4314_v26 }
 0x5ce   :  { %v2041_v63 = vadd.f32 %v2024_v13, %v1988_v10  ;;  %v2042_v0 = vadd.f32 %v2028_v14, %v1989_v11  ;;  %v2043_v1 = vadd.f32 %v2024_v13, %v1990_v56  ;;  %v2044_v48 = vadd.f32 %v2028_v14, %v1991_v57 }
 0x5cf   :  { %v2032_v5 = vrot.slane %v2020_v58, %v4317_v28  ;;  %v2036_v15 = vrot.slane %v2020_v58, %v4314_v26  ;;  %v2368_v10 = vrot.slane %v2367_v27, 1  ;;  %v2379_v57 = vadd.f32 %v2378_v4, %v2377_v55 }
 0x5d0   :  { %v2065_v16 = vadd.f32 %v2052_v43, %v2041_v63  ;;  %v2066_v49 = vadd.f32 %v2056_v39, %v2042_v0  ;;  %v2067_v29 = vadd.f32 %v2052_v43, %v2043_v1  ;;  %v2068_v18 = vadd.f32 %v2056_v39, %v2044_v48 }
 0x5d1   :  { %v2045_v19 = vadd.f32 %v2032_v5, %v1992_v2  ;;  %v2046_v20 = vadd.f32 %v2036_v15, %v1993_v3  ;;  %v2047_v30 = vadd.f32 %v2032_v5, %v1994_v12  ;;  %v2048_v21 = vadd.f32 %v2036_v15, %v1995_v62 }
 0x5d2   :  { %v2324_v23 = vmul.f32 %v2065_v16, %v4471_v17  ;;  %v2325_v32 = vmul.f32 %v2066_v49, %v4471_v17  ;;  %v2326_v33 = vmul.f32 %v2067_v29, %v1976_v41  ;;  %v2327_v7 = vmul.f32 %v2068_v18, %v1976_v41 }
 0x5d3   :  { %v2069_v35 = vadd.f32 %v2060_v34, %v2045_v19  ;;  %v2070_v45 = vadd.f32 %v2064_v47, %v2046_v20  ;;  %v2071_v36 = vadd.f32 %v2060_v34, %v2047_v30  ;;  %v2072_v24 = vadd.f32 %v2064_v47, %v2048_v21  ;;  %v4180_v15 = vpop.eup %4179 }
 0x5d4   :  { %v2332_v38 = vadd.f32 %v2326_v33, %v2324_v23  ;;  %v2339_v42 = vadd.f32 %v2327_v7, %v2325_v32  ;;  %v2384_v41 = vrot.slane %v2383_v61, 2  ;;  %v2409_v47 = vrot.slane %v2407_v22, 2 }
 0x5d5   :  { %v2328_v43 = vmul.f32 %v2069_v35, %v1983_v59  ;;  %v2329_v39 = vmul.f32 %v2070_v45, %v1983_v59  ;;  %v2330_v25 = vmul.f32 %v2071_v36, %v4464_v52  ;;  %v2331_v44 = vmul.f32 %v2072_v24, %v4464_v52 }
 0x5d6   :  { %v2333_v31 = vrot.slane %v2332_v38, 4  ;;  %v2340_v17 = vrot.slane %v2339_v42, 4  ;;  %v2385_v52 = vadd.f32 %v2384_v41, %v2383_v61  ;;  %4181 = vrcp.f32 %v2409_v47  ;;  %v4084_v41 = vld [vmem:[#allocation2 + $0x8d4] ss:$8 sps:$4 sm:$0xff]  }
 0x5d7   :  { %v2346_v50 = vadd.f32 %v2330_v25, %v2328_v43  ;;  %v2353_v53 = vadd.f32 %v2331_v44, %v2329_v39  ;;  %v2380_v62 = vrot.slane %v2379_v57, 1  ;;  %v2369_v48 = vadd.f32 %v2368_v10, %v2367_v27  ;;  %v4090_v47 = vld [vmem:[#allocation2 + $0x8f4] ss:$8 sps:$4 sm:$0xff]  }
 0x5d8   :  { %v2334_v34 = vadd.f32 %v2333_v31, %v2332_v38  ;;  %v2341_v6 = vadd.f32 %v2340_v17, %v2339_v42  ;;  %v2386_v63 = vrot.slane %v2385_v52, 1  ;;  %v2375_v2 = vadd.f32 %v2374_v8, %v2373_v46  ;;  %v4081_v17 = vld [vmem:[#allocation2 + $0x8c4] ss:$8 sps:$4 sm:$0xff]   ;;  %v4079_v46 = vld [vmem:[#allocation2 + $0x8c0] ss:$8 sps:$4 sm:$0xff]  }
 0x5d9   :  { %v2347_v9 = vrot.slane %v2346_v50, 4  ;;  %v2354_v54 = vrot.slane %v2353_v53, 4  ;;  %v2381_v29 = vadd.f32 %v2380_v62, %v2379_v57  ;;  %2919 = vmatprep.subr.bf16.mxu1 %v4081_v17  ;;  %v4096_v10 = vld [vmem:[#allocation2 + $0x914] ss:$8 sps:$4 sm:$0xff]   ;;  %v4097_v57 = vld [vmem:[#allocation2 + $0x920] ss:$8 sps:$4 sm:$0xff]  }
 0x5da   :  { %v2335_v11 = vrot.slane %v2334_v34, 2  ;;  %v2342_v56 = vrot.slane %v2341_v6, 2  ;;  %v2387_v18 = vadd.f32 %v2386_v63, %v2385_v52  ;;  %2920 = vmatpush1.bf16.msra.mxu1 %v4079_v46  ;;  %v4102_v52 = vld [vmem:[#allocation2 + $0x934] ss:$8 sps:$4 sm:$0xff]   ;;  %v4103_v8 = vld [vmem:[#allocation2 + $0x940] ss:$8 sps:$4 sm:$0xff]  }
 0x5db   :  { %v2348_v58 = vadd.f32 %v2347_v9, %v2346_v50  ;;  %v2355_v37 = vadd.f32 %v2354_v54, %v2353_v53  ;;  %v4082_v50 = vld [vmem:[#allocation2 + $0x8d0] ss:$8 sps:$4 sm:$0xff]   ;;  %2921 = vmatprep.subr.bf16.mxu1 %v4084_v41  ;;  %v4087_v53 = vld [vmem:[#allocation2 + $0x8e4] ss:$8 sps:$4 sm:$0xff]   ;;  %v4091_v9 = vld [vmem:[#allocation2 + $0x900] ss:$8 sps:$4 sm:$0xff]  }
 0x5dc   :  { %v2336_v13 = vadd.f32 %v2335_v11, %v2334_v34  ;;  %v2343_v51 = vadd.f32 %v2342_v56, %v2341_v6  ;;  %v4085_v34 = vld [vmem:[#allocation2 + $0x8e0] ss:$8 sps:$4 sm:$0xff]   ;;  %v4088_v6 = vld [vmem:[#allocation2 + $0x8f0] ss:$8 sps:$4 sm:$0xff]   ;;  %v4093_v54 = vld [vmem:[#allocation2 + $0x904] ss:$8 sps:$4 sm:$0xff]  }
 0x5dd   :  { %v2349_v14 = vrot.slane %v2348_v58, 2  ;;  %v2356_v59 = vrot.slane %v2355_v37, 2  ;;  %3146 = vmatprep.subr.bf16.mxu0 %v4093_v54  ;;  %v4094_v11 = vld [vmem:[#allocation2 + $0x910] ss:$8 sps:$4 sm:$0xff]   ;;  %v4099_v56 = vld [vmem:[#allocation2 + $0x924] ss:$8 sps:$4 sm:$0xff]  }
 0x5de   :  { %v2337_v60 = vrot.slane %v2336_v13, 1  ;;  %v2344_v12 = vrot.slane %v2343_v51, 1  ;;  %2922 = vmatpush1.bf16.msra.mxu1 %v4082_v50  ;;  %v4117_v62 = vld [vmem:[#allocation2 + $0x984] ss:$8 sps:$4 sm:$0xff]   ;;  %v4115_v63 = vld [vmem:[#allocation2 + $0x980] ss:$8 sps:$4 sm:$0xff]  }
 0x5df   :  { %v2350_v0 = vadd.f32 %v2349_v14, %v2348_v58  ;;  %v2357_v1 = vadd.f32 %v2356_v59, %v2355_v37  ;;  %2923 = vmatprep.subr.bf16.mxu1 %v4087_v53  ;;  %v4100_v58 = vld [vmem:[#allocation2 + $0x930] ss:$8 sps:$4 sm:$0xff]   ;;  %v4105_v37 = vld [vmem:[#allocation2 + $0x944] ss:$8 sps:$4 sm:$0xff]   ;;  %v4109_v59 = vld [vmem:[#allocation2 + $0x960] ss:$8 sps:$4 sm:$0xff]  }
 0x5e0   :  { %v2338_v3 = vadd.f32 %v2337_v60, %v2336_v13  ;;  %v2345_v5 = vadd.f32 %v2344_v12, %v2343_v51  ;;  %v4182_v32 = vpop.eup %4181  ;;  %v4108_v13 = vld [vmem:[#allocation2 + $0x954] ss:$8 sps:$4 sm:$0xff]   ;;  %v4106_v51 = vld [vmem:[#allocation2 + $0x950] ss:$8 sps:$4 sm:$0xff]   ;;  %v4111_v14 = vld [vmem:[#allocation2 + $0x964] ss:$8 sps:$4 sm:$0xff]  }
 0x5e1   :  { %v2351_v55 = vrot.slane %v2350_v0, 1  ;;  %v2358_v61 = vrot.slane %v2357_v1, 1  ;;  %v4114_v60 = vld [vmem:[#allocation2 + $0x974] ss:$8 sps:$4 sm:$0xff]   ;;  %v4112_v12 = vld [vmem:[#allocation2 + $0x970] ss:$8 sps:$4 sm:$0xff]  }
 0x5e2   :  { %v2388_v16 = vadd.f32 %v2369_v48, %v2338_v3  ;;  %v2389_v49 = vadd.f32 %v2375_v2, %v2345_v5  ;;  %2924 = vmatpush1.bf16.msra.mxu1 %v4085_v34  ;;  %v4123_v48 = vld [vmem:[#allocation2 + $0x9a4] ss:$8 sps:$4 sm:$0xff]   ;;  %v4121_v2 = vld [vmem:[#allocation2 + $0x9a0] ss:$8 sps:$4 sm:$0xff]   ;;  %v4126_v3 = vld [vmem:[#allocation2 + $0x9b4] ss:$8 sps:$4 sm:$0xff]  }
 0x5e3   :  { %v2352_v19 = vadd.f32 %v2351_v55, %v2350_v0  ;;  %v2359_v20 = vadd.f32 %v2358_v61, %v2357_v1  ;;  %2925 = vmatprep.subr.bf16.mxu1 %v4090_v47  ;;  %v4120_v0 = vld [vmem:[#allocation2 + $0x994] ss:$8 sps:$4 sm:$0xff]   ;;  %v4118_v1 = vld [vmem:[#allocation2 + $0x990] ss:$8 sps:$4 sm:$0xff]   ;;  %v4129_v55 = vld [vmem:[#allocation2 + $0x9c4] ss:$8 sps:$4 sm:$0xff]  }
 0x5e4   :  { %v2413_v21 = vmul.f32 %v4180_v15, %v2388_v16  ;;  %v2414_v23 = vmul.f32 %v4180_v15, %v2389_v49  ;;  %v4124_v5 = vld [vmem:[#allocation2 + $0x9b0] ss:$8 sps:$4 sm:$0xff]   ;;  %v4127_v61 = vld [vmem:[#allocation2 + $0x9c0] ss:$8 sps:$4 sm:$0xff]   ;;  %v4132_v15 = vld [vmem:[#allocation2 + $0x9d4] ss:$8 sps:$4 sm:$0xff]  }
 0x5e5   :  { %v2390_v30 = vadd.f32 %v2381_v29, %v2352_v19  ;;  %v2391_v22 = vadd.f32 %v2387_v18, %v2359_v20  ;;  %v4130_v16 = vld [vmem:[#allocation2 + $0x9d0] ss:$8 sps:$4 sm:$0xff]   ;;  %v2456_v49 = vld [vmem:[#allocation4 + $0x7] ss:$8 sm:$0x3] }
 0x5e6   :  { %v2418_v35 = vpack.c.bf16 %v2413_v21, %v2413_v21  ;;  %v2419_v36 = vpack.c.bf16 %v2414_v23, %v2414_v23  ;;  %2926 = vmatpush1.bf16.msra.mxu1 %v4088_v6  ;;  %v2461_v29 = vrot.slane %v2456_v49, %v4317_v28  ;;  %v2465_v18 = vrot.slane %v2456_v49, %v4314_v26  ;;  %v2974_v53 = vld [vmem:[#allocation4 + $0x11] ss:$8 sm:$0x3] }
 0x5e7   :  { %v2416_v33 = vmul.f32 %v4182_v32, %v2390_v30  ;;  %v2417_v7 = vmul.f32 %v4182_v32, %v2391_v22  ;;  %v2979_v34 = vrot.slane %v2974_v53, %v4317_v28  ;;  %v2983_v47 = vrot.slane %v2974_v53, %v4314_v26 }
 0x5e8   :  { %v2473_v40 = vunpack.c.l.b16 %v2419_v36  ;;  %v2472_v39 = vunpack.c.l.b16 %v2418_v35  ;;  %v4133_v36 = vld [vmem:[#allocation2 + $0x9e0] ss:$8 sps:$4 sm:$0xff]  }
 0x5e9   :  { %v2420_v45 = vpack.c.bf16 %v2416_v33, %v2416_v33  ;;  %v2421_v24 = vpack.c.bf16 %v2417_v7, %v2417_v7 }
 0x5eb   :  { %v2475_v38 = vunpack.c.l.b16 %v2421_v24  ;;  %v2474_v42 = vunpack.c.l.b16 %v2420_v45  ;;  %v4135_v45 = vld [vmem:[#allocation2 + $0x9e4] ss:$8 sps:$4 sm:$0xff]   ;;  %v4138_v24 = vld [vmem:[#allocation2 + $0x9f4] ss:$8 sps:$4 sm:$0xff]  }
 0x5ed   :  { %v2478_v43 = vrot.slane %v2475_v38, 7  ;;  %v2476_v25 = vrot.slane %v2474_v42, 7  ;;  %v4136_v38 = vld [vmem:[#allocation2 + $0x9f0] ss:$8 sps:$4 sm:$0xff]  }
 0x5ee   :  { %v2723_v42 = vld [vmem:[#allocation4 + $0x10] ss:$8 sm:$0x3] }
 0x5ef   :  { %v2479_v44 = vsel %vm1159_vm0, %v2478_v43, %v2473_v40  ;;  %v2477_v27 = vsel %vm1159_vm0, %v2476_v25, %v2472_v39  ;;  %v2728_v40 = vrot.slane %v2723_v42, %v4317_v28  ;;  %v2732_v43 = vrot.slane %v2723_v42, %v4314_v26 }
 0x5f0   :  { %v2481_v4 = vpack.c.b16 %v2479_v44, %v2479_v44  ;;  %v2480_v31 = vpack.c.b16 %v2477_v27, %v2477_v27 }
 0x5f2   :  { %2676 = vmatprep.mubr.bf16.mxu0 %v2481_v4 }
 0x5f3   :  { %2677 = vmatmul.mubr.bf16.vlgmr.msra.gmra.mrb[16].mxu0 %v2480_v31 }
 0x5f4   :  { %3147 = vmatpush1.bf16.msra.mxu0 %v4091_v9 }
 0x5f5   :  { %3148 = vmatprep.subr.bf16.mxu0 %v4096_v10 }
 0x5f8   :  { %3149 = vmatpush1.bf16.msra.mxu0 %v4094_v11 }
 0x5f9   :  { %3150 = vmatprep.subr.bf16.mxu0 %v4099_v56 }
 0x5fc   :  { %3151 = vmatpush1.bf16.msra.mxu0 %v4097_v57 }
 0x5fd   :  { %3152 = vmatprep.subr.bf16.mxu0 %v4102_v52 }
 0x600   :  { %3153 = vmatpush1.bf16.msra.mxu0 %v4100_v58 }
 0x601   :  { %3154 = vmatprep.subr.bf16.mxu0 %v4105_v37 }
 0x604   :  { %3155 = vmatpush1.bf16.msra.mxu0 %v4103_v8 }
 0x605   :  { %3156 = vmatprep.subr.bf16.mxu0 %v4108_v13 }
 0x608   :  { %3157 = vmatpush1.bf16.msra.mxu0 %v4106_v51 }
 0x609   :  { %3158 = vmatprep.subr.bf16.mxu0 %v4111_v14 }
 0x60c   :  { %3159 = vmatpush1.bf16.msra.mxu0 %v4109_v59 }
 0x60d   :  { %3160 = vmatprep.subr.bf16.mxu0 %v4114_v60 }
 0x610   :  { %3161 = vmatpush1.bf16.msra.mxu0 %v4112_v12 }
 0x611   :  { %3162 = vmatprep.subr.bf16.mxu0 %v4117_v62 }
 0x614   :  { %3163 = vmatpush1.bf16.msra.mxu0 %v4115_v63 }
 0x615   :  { %3164 = vmatprep.subr.bf16.mxu0 %v4120_v0 }
 0x618   :  { %3165 = vmatpush1.bf16.msra.mxu0 %v4118_v1 }
 0x619   :  { %3166 = vmatprep.subr.bf16.mxu0 %v4123_v48 }
 0x61c   :  { %3167 = vmatpush1.bf16.msra.mxu0 %v4121_v2 }
 0x61d   :  { %3168 = vmatprep.subr.bf16.mxu0 %v4126_v3 }
 0x620   :  { %3169 = vmatpush1.bf16.msra.mxu0 %v4124_v5 }
 0x621   :  { %3170 = vmatprep.subr.bf16.mxu0 %v4129_v55 }
 0x624   :  { %3171 = vmatpush1.bf16.msra.mxu0 %v4127_v61 }
 0x625   :  { %3172 = vmatprep.subr.bf16.mxu0 %v4132_v15 }
 0x628   :  { %3173 = vmatpush1.bf16.msra.mxu0 %v4130_v16 }
 0x629   :  { %3174 = vmatprep.subr.bf16.mxu0 %v4135_v45 }
 0x62c   :  { %3175 = vmatpush1.bf16.msra.mxu0 %v4133_v36 }
 0x62d   :  { %3176 = vmatprep.subr.bf16.mxu0 %v4138_v24 }
 0x630   :  { %3177 = vmatpush1.bf16.msra.mxu0 %v4136_v38 }
 0x6c6   :  { %v2678_v19 = vpop.f32.mrb[16].mxu0 }
 0x6c7   :  { %v2679_v20 = vadd.f32 %v2678_v19, %v2461_v29  ;;  %v2680_v30 = vpop.f32.mrb[17].mxu0 }
 0x6c8   :  { %v2681_v21 = vadd.f32 %v2680_v30, %v2465_v18  ;;  %v2682_v22 = vpop.f32.mrb[18].mxu0 }
 0x6c9   :  { %4183 = vtanh.f32 %v2679_v20  ;;  %v2683_v23 = vpop.f32.mrb[19].mxu0 }
 0x6ca   :  { %4185 = vtanh.f32 %v2681_v21 }
 0x6d3   :  { %v4184_v32 = vpop.eup %4183 }
 0x6d4   :  { %v4186_v33 = vpop.eup %4185  ;;  %v2687_v35 = vpack.c.bf16 %v4184_v32, %v4184_v32 }
 0x6d5   :  { %v2688_v7 = vpack.c.bf16 %v4186_v33, %v4186_v33 }
 0x6d7   :  { %2927 = vmatprep.mubr.bf16.mxu1 %v2688_v7 }
 0x6d8   :  { %2928 = vmatmul.mubr.bf16.vlgmr.msra.gmra.mrb[20].mxu1 %v2687_v35 }
 0x7ab   :  { %v2929_v39 = vpop.f32.mrb[20].mxu1 }
 0x7ac   :  { %v2930_v25 = vadd.f32 %v2929_v39, %v2728_v40  ;;  %v2931_v44 = vpop.f32.mrb[21].mxu1 }
 0x7ad   :  { %v2932_v27 = vadd.f32 %v2931_v44, %v2732_v43  ;;  %v2933_v4 = vpop.f32.mrb[22].mxu1 }
 0x7ae   :  { %v2936_v31 = vmax.f32 %v2930_v25, 0.0  ;;  %v2934_v17 = vpop.f32.mrb[23].mxu1 }
 0x7af   :  { %v2937_v46 = vmax.f32 %v2932_v27, 0.0 }
 0x7b0   :  { %v2938_v50 = vpack.c.bf16 %v2936_v31, %v2936_v31 }
 0x7b1   :  { %v2939_v41 = vpack.c.bf16 %v2937_v46, %v2937_v46 }
 0x7b3   :  { %3178 = vmatprep.mubr.bf16.mxu0 %v2939_v41 }
 0x7b4   :  { %3179 = vmatmul.mubr.bf16.vlgmr.msra.gmra.mrb[20].mxu0 %v2938_v50 }
 0x887   :  { %v3180_v6 = vpop.f32.mrb[20].mxu0 }
 0x888   :  { %v3181_v9 = vadd.f32 %v3180_v6, %v2979_v34  ;;  %v3182_v54 = vpop.f32.mrb[21].mxu0 }
 0x889   :  { %v3183_v10 = vadd.f32 %v3182_v54, %v2983_v47  ;;  %v3184_v11 = vpop.f32.mrb[22].mxu0 }
 0x88a   :  { %v3583_v56 = vmul.f32 -1.442695, %v3181_v9  ;;  %v3185_v57 = vpop.f32.mrb[23].mxu0 }
 0x88b   :  { %v3584_v52 = vmul.f32 -1.442695, %v3183_v10 }
 0x88c   :  { %4187 = vpow2.f32 %v3583_v56 }
 0x88d   :  { %4189 = vpow2.f32 %v3584_v52 }
 0x896   :  { %v4188_v58 = vpop.eup %4187 }
 0x897   :  { %v4190_v37 = vpop.eup %4189  ;;  %v3193_v8 = vadd.f32 1.0, %v4188_v58 }
 0x898   :  { %v3194_v13 = vadd.f32 1.0, %v4190_v37 }
 0x899   :  { %4191 = vrcp.f32 %v3193_v8 }
 0x89a   :  { %4193 = vrcp.f32 %v3194_v13 }
 0x8a3   :  { %v4192_v51 = vpop.eup %4191 }
 0x8a4   :  { %v4194_v28 = vpop.eup %4193  ;;  %v3199_v14 = vmul.f32 2.0, %v4192_v51 }
 0x8a5   :  { %v3200_v26 = vmul.f32 2.0, %v4194_v28 }
 0x8a6   :  { %v3585_v59 = vadd.f32 -0.5, %v3199_v14 }
 0x8a7   :  { %v3586_v60 = vadd.f32 -0.5, %v3200_v26 }
 0x8a9   :  { %v3205_v12 = vcombine.low %v3585_v59, %v3586_v60 }
 0x8ab   :  { %3587 = vst.sshfl [vmem:[%s4522_s5] sm:$0x33 pattern:$0x76325410] %v3205_v12 }
 0x8ac   :  { %3219 = vsyncpa [#allocation3], 1 }
 0x8ad   :  { %3220 = vsyncpa [#allocation5], 1 }

</bundles_post_ra>
